<compile_context>
chip_gen: v7x
topology: tpu7x:2x2x1
jax: 0.10.0
libtpu: 0.0.40
codegen_flags: <defaults>
</compile_context>

<pallas_src>
import functools

import jax
import jax.numpy as jnp
from jax.experimental import pallas as pl
from jax.experimental.pallas import tpu as pltpu


# ----------------------------------------------------------------------------
# Fused kernel: num_layers-deep LSTM over the whole sequence + final Linear.
# ----------------------------------------------------------------------------
def _make_fused_kernel(num_layers, seq_len, hidden, batch_pad, mm_dtype):
    H = hidden
    S = seq_len
    # Bounded unroll: full only for short windows (perf-review item).
    unroll = S if S <= 16 else 4

    def kernel(x_ref, *args):
        # args layout:
        #   [w_ih_0, w_hh_0, b_0, ..., w_ih_{L-1}, w_hh_{L-1}, b_{L-1},
        #    fc_w, fc_b, out_ref, xw_ref, hseq_ref]
        layer_refs = args[:3 * num_layers]
        fc_w_ref = args[3 * num_layers]
        fc_b_ref = args[3 * num_layers + 1]
        out_ref = args[3 * num_layers + 2]
        xw_ref = args[3 * num_layers + 3]     # (S*B_pad, 4H) f32 scratch
        hseq_ref = args[3 * num_layers + 4]   # (S*B_pad, H)  f32 scratch

        zeros = jnp.zeros((batch_pad, H), jnp.float32)
        h_last = zeros

        for l in range(num_layers):
            w_ih = layer_refs[3 * l][...]       # (D_l, 4H)  mm_dtype
            w_hh = layer_refs[3 * l + 1][...]   # (H, 4H)    mm_dtype
            bias = layer_refs[3 * l + 2][...]   # (1, 4H)    f32
            last = (l == num_layers - 1)

            # Layer-major: one big input->hidden matmul for the whole sequence
            # (bias folded in), off the serial per-step critical path.
            inp_seq = x_ref[...] if l == 0 else hseq_ref[...]
            xw_ref[...] = (
                jnp.dot(inp_seq.astype(mm_dtype), w_ih,
                        preferred_element_type=jnp.float32) + bias)

            # TODO(synk): W_hh could be held resident in MXU staging registers
            # across the time loop (pltpu.matmul_push_rhs / matmul_acc_lhs);
            # left on the portable jnp.dot path for robustness.
            def step(t, carry):
                h, c = carry
                row = pl.multiple_of(t * batch_pad, batch_pad)
                gates = (xw_ref[pl.ds(row, batch_pad), :]
                         + jnp.dot(h.astype(mm_dtype), w_hh,
                                   preferred_element_type=jnp.float32))
                # One sigmoid over the full (B_pad, 4H) gate tensor; g-gate
                # columns were pre-scaled by 2 so tanh(g) = 2*sigmoid(2g) - 1.
                s = jax.nn.sigmoid(gates)
                i_g = s[:, 0 * H:1 * H]
                f_g = s[:, 1 * H:2 * H]
                g_g = 2.0 * s[:, 2 * H:3 * H] - 1.0
                o_g = s[:, 3 * H:4 * H]
                c = f_g * c + i_g * g_g
                h = o_g * jnp.tanh(c)
                if not last:
                    # Whole h-sequence feeds the next layer's big matmul.
                    hseq_ref[pl.ds(row, batch_pad), :] = h
                return (h, c)

            h_last, _ = jax.lax.fori_loop(0, S, step, (zeros, zeros),
                                          unroll=unroll)

        # Final Linear (== fc(out[:, -1, :])); lane-padded -> unmasked store.
        out_ref[...] = (jnp.dot(h_last.astype(mm_dtype), fc_w_ref[...],
                                preferred_element_type=jnp.float32)
                        + fc_b_ref[...])

    return kernel


# ----------------------------------------------------------------------------
# Parameter init (PyTorch layouts) and host-side prep (transpose / scale / pad)
# ----------------------------------------------------------------------------
def init_params(key, input_size, hidden_size, num_layers, num_keys):
    """Mirrors nn.LSTM / nn.Linear shapes and uniform(-1/sqrt(H), 1/sqrt(H))."""
    k = 1.0 / float(hidden_size) ** 0.5
    keys = jax.random.split(key, 4 * num_layers + 2)
    it = iter(keys)
    lstm = []
    d = input_size
    for _ in range(num_layers):
        w_ih = jax.random.uniform(next(it), (4 * hidden_size, d),
                                  minval=-k, maxval=k, dtype=jnp.float32)
        w_hh = jax.random.uniform(next(it), (4 * hidden_size, hidden_size),
                                  minval=-k, maxval=k, dtype=jnp.float32)
        b_ih = jax.random.uniform(next(it), (4 * hidden_size,),
                                  minval=-k, maxval=k, dtype=jnp.float32)
        b_hh = jax.random.uniform(next(it), (4 * hidden_size,),
                                  minval=-k, maxval=k, dtype=jnp.float32)
        lstm.append((w_ih, w_hh, b_ih, b_hh))
        d = hidden_size
    fc_w = jax.random.uniform(next(it), (num_keys, hidden_size),
                              minval=-k, maxval=k, dtype=jnp.float32)
    fc_b = jax.random.uniform(next(it), (num_keys,),
                              minval=-k, maxval=k, dtype=jnp.float32)
    return {"lstm": lstm, "fc_w": fc_w, "fc_b": fc_b}


def prep_params(params, hidden_size, num_keys, matmul_dtype=jnp.bfloat16):
    """Kernel-friendly layouts: pre-transposed, g-gate pre-scaled, FC lane-padded.

    Matmul operands (weights) are stored in `matmul_dtype` (bf16 by default,
    f32 accumulation happens in-kernel); biases stay f32 so all elementwise
    gate math stays f32 (important on v5e: no bf16 VPU/EUP).
    """
    H = hidden_size
    # Scale the g-gate (PyTorch order i,f,g,o -> columns 2H:3H after transpose)
    # by 2 so one sigmoid recovers tanh via 2*sigmoid(2x)-1.  Exact in bf16 too.
    scale = jnp.concatenate(
        [jnp.ones((1, 2 * H), jnp.float32),
         jnp.full((1, H), 2.0, jnp.float32),
         jnp.ones((1, H), jnp.float32)], axis=1)            # (1, 4H)
    layers = []
    for (w_ih, w_hh, b_ih, b_hh) in params["lstm"]:
        w_ih_t = (w_ih.T * scale).astype(matmul_dtype)      # (D_l, 4H)
        w_hh_t = (w_hh.T * scale).astype(matmul_dtype)      # (H, 4H)
        b = ((b_ih + b_hh).reshape(1, 4 * H) * scale).astype(jnp.float32)
        layers.append((w_ih_t, w_hh_t, b))

    v_pad = pl.cdiv(num_keys, 128) * 128                    # lane-dense output
    fc_w_t = jnp.pad(params["fc_w"].T,
                     ((0, 0), (0, v_pad - num_keys))).astype(matmul_dtype)
    fc_b = jnp.pad(params["fc_b"].reshape(1, -1),
                   ((0, 0), (0, v_pad - num_keys))).astype(jnp.float32)
    return {"layers": layers, "fc_w": fc_w_t, "fc_b": fc_b}


# ----------------------------------------------------------------------------
# Forward pass (matches robustlog.forward: out = fc(lstm(input0)[:, -1, :]))
# ----------------------------------------------------------------------------
@functools.partial(jax.jit,
                   static_argnames=("num_layers", "hidden_size", "num_keys"))
def robustlog_forward(prepped, input0, *, num_layers, hidden_size, num_keys):
    B, S, D = input0.shape
    B_pad = max(8, ((B + 7) // 8) * 8)                      # f32 sublane minimum
    x = jnp.transpose(input0.astype(jnp.float32), (1, 0, 2))     # (S, B, D)
    if B_pad != B:
        x = jnp.pad(x, ((0, 0), (0, B_pad - B), (0, 0)))
    x = x.reshape(S * B_pad, D)                             # time-major 2-D rows

    flat = []
    for (w_ih_t, w_hh_t, b) in prepped["layers"]:
        flat += [w_ih_t, w_hh_t, b]
    v_pad = prepped["fc_w"].shape[1]
    mm_dtype = prepped["fc_w"].dtype

    kernel = _make_fused_kernel(num_layers, S, hidden_size, B_pad, mm_dtype)
    out_pad = pl.pallas_call(
        kernel,
        out_shape=jax.ShapeDtypeStruct((B_pad, v_pad), jnp.float32),
        scratch_shapes=[
            pltpu.VMEM((S * B_pad, 4 * hidden_size), jnp.float32),  # xW + b
            pltpu.VMEM((S * B_pad, hidden_size), jnp.float32),      # h sequence
        ],
        # Gridless -> single TensorCore.  On v7x, stack independent windows so
        # B_pad >= 16 and add a batch-tile grid with
        # dimension_semantics=("parallel",) to engage the second core.
    )(x, *flat, prepped["fc_w"], prepped["fc_b"])

    return out_pad[:B, :num_keys]


# ----------------------------------------------------------------------------
# Pure-JAX reference (PyTorch semantics) for a correctness check
# ----------------------------------------------------------------------------
def reference_forward(params, input0):
    B, S, _ = input0.shape
    H = params["lstm"][0][1].shape[1]
    x = input0.astype(jnp.float32)
    for (w_ih, w_hh, b_ih, b_hh) in params["lstm"]:
        h = jnp.zeros((B, H), jnp.float32)
        c = jnp.zeros((B, H), jnp.float32)
        outs = []
        for t in range(S):
            g = x[:, t, :] @ w_ih.T + h @ w_hh.T + b_ih + b_hh
            i_g = jax.nn.sigmoid(g[:, 0 * H:1 * H])
            f_g = jax.nn.sigmoid(g[:, 1 * H:2 * H])
            g_g = jnp.tanh(g[:, 2 * H:3 * H])
            o_g = jax.nn.sigmoid(g[:, 3 * H:4 * H])
            c = f_g * c + i_g * g_g
            h = o_g * jnp.tanh(c)
            outs.append(h)
        x = jnp.stack(outs, axis=1)
    return x[:, -1, :] @ params["fc_w"].T + params["fc_b"]


if __name__ == "__main__":
    batch = 2
    seq = 8
    input_size = 4
    hidden_size = 32
    num_layers = 2
    num_keys = 16

    key = jax.random.PRNGKey(0)
    kp, kx = jax.random.split(key, 2)

    params = init_params(kp, input_size, hidden_size, num_layers, num_keys)
    input0 = jax.random.normal(kx, (batch, seq, input_size), dtype=jnp.float32)
    ref = reference_forward(params, input0)

    # 1) f32-operand path: tight check that the layer-major kernel structure is
    #    exactly equivalent to PyTorch LSTM + Linear semantics.
    prepped_f32 = prep_params(params, hidden_size, num_keys,
                              matmul_dtype=jnp.float32)
    out_f32 = robustlog_forward(prepped_f32, input0, num_layers=num_layers,
                                hidden_size=hidden_size, num_keys=num_keys)
    out_f32 = jax.block_until_ready(out_f32)
    assert out_f32.shape == (batch, num_keys)
    assert jnp.allclose(out_f32, ref, atol=1e-3, rtol=1e-3), \
        f"f32 path max abs diff {jnp.max(jnp.abs(out_f32 - ref))}"

    # 2) Production path: bf16 MXU operands, f32 accumulation & gate math.
    prepped_bf16 = prep_params(params, hidden_size, num_keys,
                               matmul_dtype=jnp.bfloat16)
    out_bf16 = robustlog_forward(prepped_bf16, input0, num_layers=num_layers,
                                 hidden_size=hidden_size, num_keys=num_keys)
    out_bf16 = jax.block_until_ready(out_bf16)
    assert out_bf16.shape == (batch, num_keys)
    assert jnp.allclose(out_bf16, ref, atol=2e-2, rtol=2e-2), \
        f"bf16 path max abs diff {jnp.max(jnp.abs(out_bf16 - ref))}"

    print("KERNEL_OK")
</pallas_src>

<mosaic_0001>
module attributes {stable_mosaic.version = 11 : i64} {
  func.func @kernel(%arg0: memref<64x4xf32, #tpu.memory_space<vmem>>, %arg1: memref<4x128xf32, #tpu.memory_space<vmem>>, %arg2: memref<32x128xf32, #tpu.memory_space<vmem>>, %arg3: memref<1x128xf32, #tpu.memory_space<vmem>>, %arg4: memref<32x128xf32, #tpu.memory_space<vmem>>, %arg5: memref<32x128xf32, #tpu.memory_space<vmem>>, %arg6: memref<1x128xf32, #tpu.memory_space<vmem>>, %arg7: memref<32x128xf32, #tpu.memory_space<vmem>>, %arg8: memref<1x128xf32, #tpu.memory_space<vmem>>, %arg9: memref<8x128xf32, #tpu.memory_space<vmem>>, %arg10: memref<64x128xf32, #tpu.memory_space<vmem>>, %arg11: memref<64x32xf32, #tpu.memory_space<vmem>>) attributes {dimension_semantics = [], scalar_prefetch = 0 : i64, scratch_operands = 2 : i64, tpu.core_type = #tpu.core_type<tc>} {
    %cst = arith.constant 0.000000e+00 : f32
    %0 = vector.broadcast %cst : f32 to vector<8x32xf32>
    %c0 = arith.constant 0 : index
    %c0_0 = arith.constant 0 : index
    %1 = vector.load %arg1[%c0, %c0_0] : memref<4x128xf32, #tpu.memory_space<vmem>>, vector<4x128xf32>
    %c0_1 = arith.constant 0 : index
    %c0_2 = arith.constant 0 : index
    %2 = vector.load %arg2[%c0_1, %c0_2] : memref<32x128xf32, #tpu.memory_space<vmem>>, vector<32x128xf32>
    %c0_3 = arith.constant 0 : index
    %c0_4 = arith.constant 0 : index
    %3 = vector.load %arg3[%c0_3, %c0_4] : memref<1x128xf32, #tpu.memory_space<vmem>>, vector<1x128xf32>
    %c0_5 = arith.constant 0 : index
    %c0_6 = arith.constant 0 : index
    %4 = vector.load %arg0[%c0_5, %c0_6] : memref<64x4xf32, #tpu.memory_space<vmem>>, vector<64x4xf32>
    %cst_7 = arith.constant dense<0.000000e+00> : vector<64x128xf32>
    %5 = tpu.matmul %4, %1, %cst_7 {dimension_numbers = #tpu.dot_dimension_numbers<[1], [0], [0], [1], [0, 0, 1, 1], [], []>} : vector<64x4xf32>, vector<4x128xf32>, vector<64x128xf32> -> vector<64x128xf32>
    %6 = vector.broadcast %3 : vector<1x128xf32> to vector<64x128xf32>
    %7 = arith.addf %5, %6 : vector<64x128xf32>
    %c0_8 = arith.constant 0 : index
    %c0_9 = arith.constant 0 : index
    %8 = vector.load %arg10[%c0_8, %c0_9] : memref<64x128xf32, #tpu.memory_space<vmem>>, vector<64x128xf32>
    tpu.vector_store %arg10[%c0_8, %c0_9], %7 {strides = array<i32>} : memref<64x128xf32, #tpu.memory_space<vmem>>, vector<64x128xf32>,
    %c0_i32 = arith.constant 0 : i32
    %c8_i32 = arith.constant 8 : i32
    %9 = arith.muli %c0_i32, %c8_i32 : i32
    %10 = tpu.assume_multiple %9, 8 : i32
    %11 = arith.index_cast %10 : i32 to index
    %c0_10 = arith.constant 0 : index
    %12 = vector.load %arg10[%11, %c0_10] : memref<64x128xf32, #tpu.memory_space<vmem>>, vector<8x128xf32>
    %cst_11 = arith.constant dense<0.000000e+00> : vector<8x128xf32>
    %13 = tpu.matmul %0, %2, %cst_11 {dimension_numbers = #tpu.dot_dimension_numbers<[1], [0], [0], [1], [0, 0, 1, 1], [], []>} : vector<8x32xf32>, vector<32x128xf32>, vector<8x128xf32> -> vector<8x128xf32>
    %14 = arith.addf %12, %13 : vector<8x128xf32>
    %15 = arith.negf %14 : vector<8x128xf32>
    %16 = math.exp %15 : vector<8x128xf32>
    %cst_12 = arith.constant 1.000000e+00 : f32
    %17 = vector.broadcast %cst_12 : f32 to vector<8x128xf32>
    %18 = arith.addf %17, %16 : vector<8x128xf32>
    %19 = arith.divf %17, %18 : vector<8x128xf32>
    %20 = vector.extract_strided_slice %19 {offsets = [0, 0], sizes = [8, 32], strides = [1, 1]} : vector<8x128xf32> to vector<8x32xf32>
    %21 = vector.extract_strided_slice %19 {offsets = [0, 32], sizes = [8, 32], strides = [1, 1]} : vector<8x128xf32> to vector<8x32xf32>
    %22 = vector.extract_strided_slice %19 {offsets = [0, 64], sizes = [8, 32], strides = [1, 1]} : vector<8x128xf32> to vector<8x32xf32>
    %cst_13 = arith.constant 2.000000e+00 : f32
    %23 = vector.broadcast %cst_13 : f32 to vector<8x32xf32>
    %24 = arith.mulf %23, %22 : vector<8x32xf32>
    %cst_14 = arith.constant 1.000000e+00 : f32
    %25 = vector.broadcast %cst_14 : f32 to vector<8x32xf32>
    %26 = arith.subf %24, %25 : vector<8x32xf32>
    %27 = vector.extract_strided_slice %19 {offsets = [0, 96], sizes = [8, 32], strides = [1, 1]} : vector<8x128xf32> to vector<8x32xf32>
    %28 = arith.mulf %21, %0 : vector<8x32xf32>
    %29 = arith.mulf %20, %26 : vector<8x32xf32>
    %30 = arith.addf %28, %29 : vector<8x32xf32>
    %31 = math.tanh %30 : vector<8x32xf32>
    %32 = arith.mulf %27, %31 : vector<8x32xf32>
    %33 = arith.index_cast %10 : i32 to index
    %c0_15 = arith.constant 0 : index
    %34 = vector.load %arg11[%33, %c0_15] : memref<64x32xf32, #tpu.memory_space<vmem>>, vector<8x32xf32>
    tpu.vector_store %arg11[%33, %c0_15], %32 {strides = array<i32>} : memref<64x32xf32, #tpu.memory_space<vmem>>, vector<8x32xf32>,
    %c1_i32 = arith.constant 1 : i32
    %c8_i32_16 = arith.constant 8 : i32
    %35 = arith.muli %c1_i32, %c8_i32_16 : i32
    %36 = tpu.assume_multiple %35, 8 : i32
    %37 = arith.index_cast %36 : i32 to index
    %c0_17 = arith.constant 0 : index
    %38 = vector.load %arg10[%37, %c0_17] : memref<64x128xf32, #tpu.memory_space<vmem>>, vector<8x128xf32>
    %cst_18 = arith.constant dense<0.000000e+00> : vector<8x128xf32>
    %39 = tpu.matmul %32, %2, %cst_18 {dimension_numbers = #tpu.dot_dimension_numbers<[1], [0], [0], [1], [0, 0, 1, 1], [], []>} : vector<8x32xf32>, vector<32x128xf32>, vector<8x128xf32> -> vector<8x128xf32>
    %40 = arith.addf %38, %39 : vector<8x128xf32>
    %41 = arith.negf %40 : vector<8x128xf32>
    %42 = math.exp %41 : vector<8x128xf32>
    %cst_19 = arith.constant 1.000000e+00 : f32
    %43 = vector.broadcast %cst_19 : f32 to vector<8x128xf32>
    %44 = arith.addf %43, %42 : vector<8x128xf32>
    %45 = arith.divf %43, %44 : vector<8x128xf32>
    %46 = vector.extract_strided_slice %45 {offsets = [0, 0], sizes = [8, 32], strides = [1, 1]} : vector<8x128xf32> to vector<8x32xf32>
    %47 = vector.extract_strided_slice %45 {offsets = [0, 32], sizes = [8, 32], strides = [1, 1]} : vector<8x128xf32> to vector<8x32xf32>
    %48 = vector.extract_strided_slice %45 {offsets = [0, 64], sizes = [8, 32], strides = [1, 1]} : vector<8x128xf32> to vector<8x32xf32>
    %cst_20 = arith.constant 2.000000e+00 : f32
    %49 = vector.broadcast %cst_20 : f32 to vector<8x32xf32>
    %50 = arith.mulf %49, %48 : vector<8x32xf32>
    %cst_21 = arith.constant 1.000000e+00 : f32
    %51 = vector.broadcast %cst_21 : f32 to vector<8x32xf32>
    %52 = arith.subf %50, %51 : vector<8x32xf32>
    %53 = vector.extract_strided_slice %45 {offsets = [0, 96], sizes = [8, 32], strides = [1, 1]} : vector<8x128xf32> to vector<8x32xf32>
    %54 = arith.mulf %47, %30 : vector<8x32xf32>
    %55 = arith.mulf %46, %52 : vector<8x32xf32>
    %56 = arith.addf %54, %55 : vector<8x32xf32>
    %57 = math.tanh %56 : vector<8x32xf32>
    %58 = arith.mulf %53, %57 : vector<8x32xf32>
    %59 = arith.index_cast %36 : i32 to index
    %c0_22 = arith.constant 0 : index
    %60 = vector.load %arg11[%59, %c0_22] : memref<64x32xf32, #tpu.memory_space<vmem>>, vector<8x32xf32>
    tpu.vector_store %arg11[%59, %c0_22], %58 {strides = array<i32>} : memref<64x32xf32, #tpu.memory_space<vmem>>, vector<8x32xf32>,
    %c2_i32 = arith.constant 2 : i32
    %c8_i32_23 = arith.constant 8 : i32
    %61 = arith.muli %c2_i32, %c8_i32_23 : i32
    %62 = tpu.assume_multiple %61, 8 : i32
    %63 = arith.index_cast %62 : i32 to index
    %c0_24 = arith.constant 0 : index
    %64 = vector.load %arg10[%63, %c0_24] : memref<64x128xf32, #tpu.memory_space<vmem>>, vector<8x128xf32>
    %cst_25 = arith.constant dense<0.000000e+00> : vector<8x128xf32>
    %65 = tpu.matmul %58, %2, %cst_25 {dimension_numbers = #tpu.dot_dimension_numbers<[1], [0], [0], [1], [0, 0, 1, 1], [], []>} : vector<8x32xf32>, vector<32x128xf32>, vector<8x128xf32> -> vector<8x128xf32>
    %66 = arith.addf %64, %65 : vector<8x128xf32>
    %67 = arith.negf %66 : vector<8x128xf32>
    %68 = math.exp %67 : vector<8x128xf32>
    %cst_26 = arith.constant 1.000000e+00 : f32
    %69 = vector.broadcast %cst_26 : f32 to vector<8x128xf32>
    %70 = arith.addf %69, %68 : vector<8x128xf32>
    %71 = arith.divf %69, %70 : vector<8x128xf32>
    %72 = vector.extract_strided_slice %71 {offsets = [0, 0], sizes = [8, 32], strides = [1, 1]} : vector<8x128xf32> to vector<8x32xf32>
    %73 = vector.extract_strided_slice %71 {offsets = [0, 32], sizes = [8, 32], strides = [1, 1]} : vector<8x128xf32> to vector<8x32xf32>
    %74 = vector.extract_strided_slice %71 {offsets = [0, 64], sizes = [8, 32], strides = [1, 1]} : vector<8x128xf32> to vector<8x32xf32>
    %cst_27 = arith.constant 2.000000e+00 : f32
    %75 = vector.broadcast %cst_27 : f32 to vector<8x32xf32>
    %76 = arith.mulf %75, %74 : vector<8x32xf32>
    %cst_28 = arith.constant 1.000000e+00 : f32
    %77 = vector.broadcast %cst_28 : f32 to vector<8x32xf32>
    %78 = arith.subf %76, %77 : vector<8x32xf32>
    %79 = vector.extract_strided_slice %71 {offsets = [0, 96], sizes = [8, 32], strides = [1, 1]} : vector<8x128xf32> to vector<8x32xf32>
    %80 = arith.mulf %73, %56 : vector<8x32xf32>
    %81 = arith.mulf %72, %78 : vector<8x32xf32>
    %82 = arith.addf %80, %81 : vector<8x32xf32>
    %83 = math.tanh %82 : vector<8x32xf32>
    %84 = arith.mulf %79, %83 : vector<8x32xf32>
    %85 = arith.index_cast %62 : i32 to index
    %c0_29 = arith.constant 0 : index
    %86 = vector.load %arg11[%85, %c0_29] : memref<64x32xf32, #tpu.memory_space<vmem>>, vector<8x32xf32>
    tpu.vector_store %arg11[%85, %c0_29], %84 {strides = array<i32>} : memref<64x32xf32, #tpu.memory_space<vmem>>, vector<8x32xf32>,
    %c3_i32 = arith.constant 3 : i32
    %c8_i32_30 = arith.constant 8 : i32
    %87 = arith.muli %c3_i32, %c8_i32_30 : i32
    %88 = tpu.assume_multiple %87, 8 : i32
    %89 = arith.index_cast %88 : i32 to index
    %c0_31 = arith.constant 0 : index
    %90 = vector.load %arg10[%89, %c0_31] : memref<64x128xf32, #tpu.memory_space<vmem>>, vector<8x128xf32>
    %cst_32 = arith.constant dense<0.000000e+00> : vector<8x128xf32>
    %91 = tpu.matmul %84, %2, %cst_32 {dimension_numbers = #tpu.dot_dimension_numbers<[1], [0], [0], [1], [0, 0, 1, 1], [], []>} : vector<8x32xf32>, vector<32x128xf32>, vector<8x128xf32> -> vector<8x128xf32>
    %92 = arith.addf %90, %91 : vector<8x128xf32>
    %93 = arith.negf %92 : vector<8x128xf32>
    %94 = math.exp %93 : vector<8x128xf32>
    %cst_33 = arith.constant 1.000000e+00 : f32
    %95 = vector.broadcast %cst_33 : f32 to vector<8x128xf32>
    %96 = arith.addf %95, %94 : vector<8x128xf32>
    %97 = arith.divf %95, %96 : vector<8x128xf32>
    %98 = vector.extract_strided_slice %97 {offsets = [0, 0], sizes = [8, 32], strides = [1, 1]} : vector<8x128xf32> to vector<8x32xf32>
    %99 = vector.extract_strided_slice %97 {offsets = [0, 32], sizes = [8, 32], strides = [1, 1]} : vector<8x128xf32> to vector<8x32xf32>
    %100 = vector.extract_strided_slice %97 {offsets = [0, 64], sizes = [8, 32], strides = [1, 1]} : vector<8x128xf32> to vector<8x32xf32>
    %cst_34 = arith.constant 2.000000e+00 : f32
    %101 = vector.broadcast %cst_34 : f32 to vector<8x32xf32>
    %102 = arith.mulf %101, %100 : vector<8x32xf32>
    %cst_35 = arith.constant 1.000000e+00 : f32
    %103 = vector.broadcast %cst_35 : f32 to vector<8x32xf32>
    %104 = arith.subf %102, %103 : vector<8x32xf32>
    %105 = vector.extract_strided_slice %97 {offsets = [0, 96], sizes = [8, 32], strides = [1, 1]} : vector<8x128xf32> to vector<8x32xf32>
    %106 = arith.mulf %99, %82 : vector<8x32xf32>
    %107 = arith.mulf %98, %104 : vector<8x32xf32>
    %108 = arith.addf %106, %107 : vector<8x32xf32>
    %109 = math.tanh %108 : vector<8x32xf32>
    %110 = arith.mulf %105, %109 : vector<8x32xf32>
    %111 = arith.index_cast %88 : i32 to index
    %c0_36 = arith.constant 0 : index
    %112 = vector.load %arg11[%111, %c0_36] : memref<64x32xf32, #tpu.memory_space<vmem>>, vector<8x32xf32>
    tpu.vector_store %arg11[%111, %c0_36], %110 {strides = array<i32>} : memref<64x32xf32, #tpu.memory_space<vmem>>, vector<8x32xf32>,
    %c4_i32 = arith.constant 4 : i32
    %c8_i32_37 = arith.constant 8 : i32
    %113 = arith.muli %c4_i32, %c8_i32_37 : i32
    %114 = tpu.assume_multiple %113, 8 : i32
    %115 = arith.index_cast %114 : i32 to index
    %c0_38 = arith.constant 0 : index
    %116 = vector.load %arg10[%115, %c0_38] : memref<64x128xf32, #tpu.memory_space<vmem>>, vector<8x128xf32>
    %cst_39 = arith.constant dense<0.000000e+00> : vector<8x128xf32>
    %117 = tpu.matmul %110, %2, %cst_39 {dimension_numbers = #tpu.dot_dimension_numbers<[1], [0], [0], [1], [0, 0, 1, 1], [], []>} : vector<8x32xf32>, vector<32x128xf32>, vector<8x128xf32> -> vector<8x128xf32>
    %118 = arith.addf %116, %117 : vector<8x128xf32>
    %119 = arith.negf %118 : vector<8x128xf32>
    %120 = math.exp %119 : vector<8x128xf32>
    %cst_40 = arith.constant 1.000000e+00 : f32
    %121 = vector.broadcast %cst_40 : f32 to vector<8x128xf32>
    %122 = arith.addf %121, %120 : vector<8x128xf32>
    %123 = arith.divf %121, %122 : vector<8x128xf32>
    %124 = vector.extract_strided_slice %123 {offsets = [0, 0], sizes = [8, 32], strides = [1, 1]} : vector<8x128xf32> to vector<8x32xf32>
    %125 = vector.extract_strided_slice %123 {offsets = [0, 32], sizes = [8, 32], strides = [1, 1]} : vector<8x128xf32> to vector<8x32xf32>
    %126 = vector.extract_strided_slice %123 {offsets = [0, 64], sizes = [8, 32], strides = [1, 1]} : vector<8x128xf32> to vector<8x32xf32>
    %cst_41 = arith.constant 2.000000e+00 : f32
    %127 = vector.broadcast %cst_41 : f32 to vector<8x32xf32>
    %128 = arith.mulf %127, %126 : vector<8x32xf32>
    %cst_42 = arith.constant 1.000000e+00 : f32
    %129 = vector.broadcast %cst_42 : f32 to vector<8x32xf32>
    %130 = arith.subf %128, %129 : vector<8x32xf32>
    %131 = vector.extract_strided_slice %123 {offsets = [0, 96], sizes = [8, 32], strides = [1, 1]} : vector<8x128xf32> to vector<8x32xf32>
    %132 = arith.mulf %125, %108 : vector<8x32xf32>
    %133 = arith.mulf %124, %130 : vector<8x32xf32>
    %134 = arith.addf %132, %133 : vector<8x32xf32>
    %135 = math.tanh %134 : vector<8x32xf32>
    %136 = arith.mulf %131, %135 : vector<8x32xf32>
    %137 = arith.index_cast %114 : i32 to index
    %c0_43 = arith.constant 0 : index
    %138 = vector.load %arg11[%137, %c0_43] : memref<64x32xf32, #tpu.memory_space<vmem>>, vector<8x32xf32>
    tpu.vector_store %arg11[%137, %c0_43], %136 {strides = array<i32>} : memref<64x32xf32, #tpu.memory_space<vmem>>, vector<8x32xf32>,
    %c5_i32 = arith.constant 5 : i32
    %c8_i32_44 = arith.constant 8 : i32
    %139 = arith.muli %c5_i32, %c8_i32_44 : i32
    %140 = tpu.assume_multiple %139, 8 : i32
    %141 = arith.index_cast %140 : i32 to index
    %c0_45 = arith.constant 0 : index
    %142 = vector.load %arg10[%141, %c0_45] : memref<64x128xf32, #tpu.memory_space<vmem>>, vector<8x128xf32>
    %cst_46 = arith.constant dense<0.000000e+00> : vector<8x128xf32>
    %143 = tpu.matmul %136, %2, %cst_46 {dimension_numbers = #tpu.dot_dimension_numbers<[1], [0], [0], [1], [0, 0, 1, 1], [], []>} : vector<8x32xf32>, vector<32x128xf32>, vector<8x128xf32> -> vector<8x128xf32>
    %144 = arith.addf %142, %143 : vector<8x128xf32>
    %145 = arith.negf %144 : vector<8x128xf32>
    %146 = math.exp %145 : vector<8x128xf32>
    %cst_47 = arith.constant 1.000000e+00 : f32
    %147 = vector.broadcast %cst_47 : f32 to vector<8x128xf32>
    %148 = arith.addf %147, %146 : vector<8x128xf32>
    %149 = arith.divf %147, %148 : vector<8x128xf32>
    %150 = vector.extract_strided_slice %149 {offsets = [0, 0], sizes = [8, 32], strides = [1, 1]} : vector<8x128xf32> to vector<8x32xf32>
    %151 = vector.extract_strided_slice %149 {offsets = [0, 32], sizes = [8, 32], strides = [1, 1]} : vector<8x128xf32> to vector<8x32xf32>
    %152 = vector.extract_strided_slice %149 {offsets = [0, 64], sizes = [8, 32], strides = [1, 1]} : vector<8x128xf32> to vector<8x32xf32>
    %cst_48 = arith.constant 2.000000e+00 : f32
    %153 = vector.broadcast %cst_48 : f32 to vector<8x32xf32>
    %154 = arith.mulf %153, %152 : vector<8x32xf32>
    %cst_49 = arith.constant 1.000000e+00 : f32
    %155 = vector.broadcast %cst_49 : f32 to vector<8x32xf32>
    %156 = arith.subf %154, %155 : vector<8x32xf32>
    %157 = vector.extract_strided_slice %149 {offsets = [0, 96], sizes = [8, 32], strides = [1, 1]} : vector<8x128xf32> to vector<8x32xf32>
    %158 = arith.mulf %151, %134 : vector<8x32xf32>
    %159 = arith.mulf %150, %156 : vector<8x32xf32>
    %160 = arith.addf %158, %159 : vector<8x32xf32>
    %161 = math.tanh %160 : vector<8x32xf32>
    %162 = arith.mulf %157, %161 : vector<8x32xf32>
    %163 = arith.index_cast %140 : i32 to index
    %c0_50 = arith.constant 0 : index
    %164 = vector.load %arg11[%163, %c0_50] : memref<64x32xf32, #tpu.memory_space<vmem>>, vector<8x32xf32>
    tpu.vector_store %arg11[%163, %c0_50], %162 {strides = array<i32>} : memref<64x32xf32, #tpu.memory_space<vmem>>, vector<8x32xf32>,
    %c6_i32 = arith.constant 6 : i32
    %c8_i32_51 = arith.constant 8 : i32
    %165 = arith.muli %c6_i32, %c8_i32_51 : i32
    %166 = tpu.assume_multiple %165, 8 : i32
    %167 = arith.index_cast %166 : i32 to index
    %c0_52 = arith.constant 0 : index
    %168 = vector.load %arg10[%167, %c0_52] : memref<64x128xf32, #tpu.memory_space<vmem>>, vector<8x128xf32>
    %cst_53 = arith.constant dense<0.000000e+00> : vector<8x128xf32>
    %169 = tpu.matmul %162, %2, %cst_53 {dimension_numbers = #tpu.dot_dimension_numbers<[1], [0], [0], [1], [0, 0, 1, 1], [], []>} : vector<8x32xf32>, vector<32x128xf32>, vector<8x128xf32> -> vector<8x128xf32>
    %170 = arith.addf %168, %169 : vector<8x128xf32>
    %171 = arith.negf %170 : vector<8x128xf32>
    %172 = math.exp %171 : vector<8x128xf32>
    %cst_54 = arith.constant 1.000000e+00 : f32
    %173 = vector.broadcast %cst_54 : f32 to vector<8x128xf32>
    %174 = arith.addf %173, %172 : vector<8x128xf32>
    %175 = arith.divf %173, %174 : vector<8x128xf32>
    %176 = vector.extract_strided_slice %175 {offsets = [0, 0], sizes = [8, 32], strides = [1, 1]} : vector<8x128xf32> to vector<8x32xf32>
    %177 = vector.extract_strided_slice %175 {offsets = [0, 32], sizes = [8, 32], strides = [1, 1]} : vector<8x128xf32> to vector<8x32xf32>
    %178 = vector.extract_strided_slice %175 {offsets = [0, 64], sizes = [8, 32], strides = [1, 1]} : vector<8x128xf32> to vector<8x32xf32>
    %cst_55 = arith.constant 2.000000e+00 : f32
    %179 = vector.broadcast %cst_55 : f32 to vector<8x32xf32>
    %180 = arith.mulf %179, %178 : vector<8x32xf32>
    %cst_56 = arith.constant 1.000000e+00 : f32
    %181 = vector.broadcast %cst_56 : f32 to vector<8x32xf32>
    %182 = arith.subf %180, %181 : vector<8x32xf32>
    %183 = vector.extract_strided_slice %175 {offsets = [0, 96], sizes = [8, 32], strides = [1, 1]} : vector<8x128xf32> to vector<8x32xf32>
    %184 = arith.mulf %177, %160 : vector<8x32xf32>
    %185 = arith.mulf %176, %182 : vector<8x32xf32>
    %186 = arith.addf %184, %185 : vector<8x32xf32>
    %187 = math.tanh %186 : vector<8x32xf32>
    %188 = arith.mulf %183, %187 : vector<8x32xf32>
    %189 = arith.index_cast %166 : i32 to index
    %c0_57 = arith.constant 0 : index
    %190 = vector.load %arg11[%189, %c0_57] : memref<64x32xf32, #tpu.memory_space<vmem>>, vector<8x32xf32>
    tpu.vector_store %arg11[%189, %c0_57], %188 {strides = array<i32>} : memref<64x32xf32, #tpu.memory_space<vmem>>, vector<8x32xf32>,
    %c7_i32 = arith.constant 7 : i32
    %c8_i32_58 = arith.constant 8 : i32
    %191 = arith.muli %c7_i32, %c8_i32_58 : i32
    %192 = tpu.assume_multiple %191, 8 : i32
    %193 = arith.index_cast %192 : i32 to index
    %c0_59 = arith.constant 0 : index
    %194 = vector.load %arg10[%193, %c0_59] : memref<64x128xf32, #tpu.memory_space<vmem>>, vector<8x128xf32>
    %cst_60 = arith.constant dense<0.000000e+00> : vector<8x128xf32>
    %195 = tpu.matmul %188, %2, %cst_60 {dimension_numbers = #tpu.dot_dimension_numbers<[1], [0], [0], [1], [0, 0, 1, 1], [], []>} : vector<8x32xf32>, vector<32x128xf32>, vector<8x128xf32> -> vector<8x128xf32>
    %196 = arith.addf %194, %195 : vector<8x128xf32>
    %197 = arith.negf %196 : vector<8x128xf32>
    %198 = math.exp %197 : vector<8x128xf32>
    %cst_61 = arith.constant 1.000000e+00 : f32
    %199 = vector.broadcast %cst_61 : f32 to vector<8x128xf32>
    %200 = arith.addf %199, %198 : vector<8x128xf32>
    %201 = arith.divf %199, %200 : vector<8x128xf32>
    %202 = vector.extract_strided_slice %201 {offsets = [0, 0], sizes = [8, 32], strides = [1, 1]} : vector<8x128xf32> to vector<8x32xf32>
    %203 = vector.extract_strided_slice %201 {offsets = [0, 32], sizes = [8, 32], strides = [1, 1]} : vector<8x128xf32> to vector<8x32xf32>
    %204 = vector.extract_strided_slice %201 {offsets = [0, 64], sizes = [8, 32], strides = [1, 1]} : vector<8x128xf32> to vector<8x32xf32>
    %cst_62 = arith.constant 2.000000e+00 : f32
    %205 = vector.broadcast %cst_62 : f32 to vector<8x32xf32>
    %206 = arith.mulf %205, %204 : vector<8x32xf32>
    %cst_63 = arith.constant 1.000000e+00 : f32
    %207 = vector.broadcast %cst_63 : f32 to vector<8x32xf32>
    %208 = arith.subf %206, %207 : vector<8x32xf32>
    %209 = vector.extract_strided_slice %201 {offsets = [0, 96], sizes = [8, 32], strides = [1, 1]} : vector<8x128xf32> to vector<8x32xf32>
    %210 = arith.mulf %203, %186 : vector<8x32xf32>
    %211 = arith.mulf %202, %208 : vector<8x32xf32>
    %212 = arith.addf %210, %211 : vector<8x32xf32>
    %213 = math.tanh %212 : vector<8x32xf32>
    %214 = arith.mulf %209, %213 : vector<8x32xf32>
    %215 = arith.index_cast %192 : i32 to index
    %c0_64 = arith.constant 0 : index
    %216 = vector.load %arg11[%215, %c0_64] : memref<64x32xf32, #tpu.memory_space<vmem>>, vector<8x32xf32>
    tpu.vector_store %arg11[%215, %c0_64], %214 {strides = array<i32>} : memref<64x32xf32, #tpu.memory_space<vmem>>, vector<8x32xf32>,
    %c8_i32_65 = arith.constant 8 : i32
    %c0_66 = arith.constant 0 : index
    %c0_67 = arith.constant 0 : index
    %217 = vector.load %arg4[%c0_66, %c0_67] : memref<32x128xf32, #tpu.memory_space<vmem>>, vector<32x128xf32>
    %c0_68 = arith.constant 0 : index
    %c0_69 = arith.constant 0 : index
    %218 = vector.load %arg5[%c0_68, %c0_69] : memref<32x128xf32, #tpu.memory_space<vmem>>, vector<32x128xf32>
    %c0_70 = arith.constant 0 : index
    %c0_71 = arith.constant 0 : index
    %219 = vector.load %arg6[%c0_70, %c0_71] : memref<1x128xf32, #tpu.memory_space<vmem>>, vector<1x128xf32>
    %c0_72 = arith.constant 0 : index
    %c0_73 = arith.constant 0 : index
    %220 = vector.load %arg11[%c0_72, %c0_73] : memref<64x32xf32, #tpu.memory_space<vmem>>, vector<64x32xf32>
    %cst_74 = arith.constant dense<0.000000e+00> : vector<64x128xf32>
    %221 = tpu.matmul %220, %217, %cst_74 {dimension_numbers = #tpu.dot_dimension_numbers<[1], [0], [0], [1], [0, 0, 1, 1], [], []>} : vector<64x32xf32>, vector<32x128xf32>, vector<64x128xf32> -> vector<64x128xf32>
    %222 = vector.broadcast %219 : vector<1x128xf32> to vector<64x128xf32>
    %223 = arith.addf %221, %222 : vector<64x128xf32>
    %c0_75 = arith.constant 0 : index
    %c0_76 = arith.constant 0 : index
    %224 = vector.load %arg10[%c0_75, %c0_76] : memref<64x128xf32, #tpu.memory_space<vmem>>, vector<64x128xf32>
    tpu.vector_store %arg10[%c0_75, %c0_76], %223 {strides = array<i32>} : memref<64x128xf32, #tpu.memory_space<vmem>>, vector<64x128xf32>,
    %c0_i32_77 = arith.constant 0 : i32
    %c8_i32_78 = arith.constant 8 : i32
    %225 = arith.muli %c0_i32_77, %c8_i32_78 : i32
    %226 = tpu.assume_multiple %225, 8 : i32
    %227 = arith.index_cast %226 : i32 to index
    %c0_79 = arith.constant 0 : index
    %228 = vector.load %arg10[%227, %c0_79] : memref<64x128xf32, #tpu.memory_space<vmem>>, vector<8x128xf32>
    %cst_80 = arith.constant dense<0.000000e+00> : vector<8x128xf32>
    %229 = tpu.matmul %0, %218, %cst_80 {dimension_numbers = #tpu.dot_dimension_numbers<[1], [0], [0], [1], [0, 0, 1, 1], [], []>} : vector<8x32xf32>, vector<32x128xf32>, vector<8x128xf32> -> vector<8x128xf32>
    %230 = arith.addf %228, %229 : vector<8x128xf32>
    %231 = arith.negf %230 : vector<8x128xf32>
    %232 = math.exp %231 : vector<8x128xf32>
    %cst_81 = arith.constant 1.000000e+00 : f32
    %233 = vector.broadcast %cst_81 : f32 to vector<8x128xf32>
    %234 = arith.addf %233, %232 : vector<8x128xf32>
    %235 = arith.divf %233, %234 : vector<8x128xf32>
    %236 = vector.extract_strided_slice %235 {offsets = [0, 0], sizes = [8, 32], strides = [1, 1]} : vector<8x128xf32> to vector<8x32xf32>
    %237 = vector.extract_strided_slice %235 {offsets = [0, 32], sizes = [8, 32], strides = [1, 1]} : vector<8x128xf32> to vector<8x32xf32>
    %238 = vector.extract_strided_slice %235 {offsets = [0, 64], sizes = [8, 32], strides = [1, 1]} : vector<8x128xf32> to vector<8x32xf32>
    %cst_82 = arith.constant 2.000000e+00 : f32
    %239 = vector.broadcast %cst_82 : f32 to vector<8x32xf32>
    %240 = arith.mulf %239, %238 : vector<8x32xf32>
    %cst_83 = arith.constant 1.000000e+00 : f32
    %241 = vector.broadcast %cst_83 : f32 to vector<8x32xf32>
    %242 = arith.subf %240, %241 : vector<8x32xf32>
    %243 = vector.extract_strided_slice %235 {offsets = [0, 96], sizes = [8, 32], strides = [1, 1]} : vector<8x128xf32> to vector<8x32xf32>
    %244 = arith.mulf %237, %0 : vector<8x32xf32>
    %245 = arith.mulf %236, %242 : vector<8x32xf32>
    %246 = arith.addf %244, %245 : vector<8x32xf32>
    %247 = math.tanh %246 : vector<8x32xf32>
    %248 = arith.mulf %243, %247 : vector<8x32xf32>
    %c1_i32_84 = arith.constant 1 : i32
    %c8_i32_85 = arith.constant 8 : i32
    %249 = arith.muli %c1_i32_84, %c8_i32_85 : i32
    %250 = tpu.assume_multiple %249, 8 : i32
    %251 = arith.index_cast %250 : i32 to index
    %c0_86 = arith.constant 0 : index
    %252 = vector.load %arg10[%251, %c0_86] : memref<64x128xf32, #tpu.memory_space<vmem>>, vector<8x128xf32>
    %cst_87 = arith.constant dense<0.000000e+00> : vector<8x128xf32>
    %253 = tpu.matmul %248, %218, %cst_87 {dimension_numbers = #tpu.dot_dimension_numbers<[1], [0], [0], [1], [0, 0, 1, 1], [], []>} : vector<8x32xf32>, vector<32x128xf32>, vector<8x128xf32> -> vector<8x128xf32>
    %254 = arith.addf %252, %253 : vector<8x128xf32>
    %255 = arith.negf %254 : vector<8x128xf32>
    %256 = math.exp %255 : vector<8x128xf32>
    %cst_88 = arith.constant 1.000000e+00 : f32
    %257 = vector.broadcast %cst_88 : f32 to vector<8x128xf32>
    %258 = arith.addf %257, %256 : vector<8x128xf32>
    %259 = arith.divf %257, %258 : vector<8x128xf32>
    %260 = vector.extract_strided_slice %259 {offsets = [0, 0], sizes = [8, 32], strides = [1, 1]} : vector<8x128xf32> to vector<8x32xf32>
    %261 = vector.extract_strided_slice %259 {offsets = [0, 32], sizes = [8, 32], strides = [1, 1]} : vector<8x128xf32> to vector<8x32xf32>
    %262 = vector.extract_strided_slice %259 {offsets = [0, 64], sizes = [8, 32], strides = [1, 1]} : vector<8x128xf32> to vector<8x32xf32>
    %cst_89 = arith.constant 2.000000e+00 : f32
    %263 = vector.broadcast %cst_89 : f32 to vector<8x32xf32>
    %264 = arith.mulf %263, %262 : vector<8x32xf32>
    %cst_90 = arith.constant 1.000000e+00 : f32
    %265 = vector.broadcast %cst_90 : f32 to vector<8x32xf32>
    %266 = arith.subf %264, %265 : vector<8x32xf32>
    %267 = vector.extract_strided_slice %259 {offsets = [0, 96], sizes = [8, 32], strides = [1, 1]} : vector<8x128xf32> to vector<8x32xf32>
    %268 = arith.mulf %261, %246 : vector<8x32xf32>
    %269 = arith.mulf %260, %266 : vector<8x32xf32>
    %270 = arith.addf %268, %269 : vector<8x32xf32>
    %271 = math.tanh %270 : vector<8x32xf32>
    %272 = arith.mulf %267, %271 : vector<8x32xf32>
    %c2_i32_91 = arith.constant 2 : i32
    %c8_i32_92 = arith.constant 8 : i32
    %273 = arith.muli %c2_i32_91, %c8_i32_92 : i32
    %274 = tpu.assume_multiple %273, 8 : i32
    %275 = arith.index_cast %274 : i32 to index
    %c0_93 = arith.constant 0 : index
    %276 = vector.load %arg10[%275, %c0_93] : memref<64x128xf32, #tpu.memory_space<vmem>>, vector<8x128xf32>
    %cst_94 = arith.constant dense<0.000000e+00> : vector<8x128xf32>
    %277 = tpu.matmul %272, %218, %cst_94 {dimension_numbers = #tpu.dot_dimension_numbers<[1], [0], [0], [1], [0, 0, 1, 1], [], []>} : vector<8x32xf32>, vector<32x128xf32>, vector<8x128xf32> -> vector<8x128xf32>
    %278 = arith.addf %276, %277 : vector<8x128xf32>
    %279 = arith.negf %278 : vector<8x128xf32>
    %280 = math.exp %279 : vector<8x128xf32>
    %cst_95 = arith.constant 1.000000e+00 : f32
    %281 = vector.broadcast %cst_95 : f32 to vector<8x128xf32>
    %282 = arith.addf %281, %280 : vector<8x128xf32>
    %283 = arith.divf %281, %282 : vector<8x128xf32>
    %284 = vector.extract_strided_slice %283 {offsets = [0, 0], sizes = [8, 32], strides = [1, 1]} : vector<8x128xf32> to vector<8x32xf32>
    %285 = vector.extract_strided_slice %283 {offsets = [0, 32], sizes = [8, 32], strides = [1, 1]} : vector<8x128xf32> to vector<8x32xf32>
    %286 = vector.extract_strided_slice %283 {offsets = [0, 64], sizes = [8, 32], strides = [1, 1]} : vector<8x128xf32> to vector<8x32xf32>
    %cst_96 = arith.constant 2.000000e+00 : f32
    %287 = vector.broadcast %cst_96 : f32 to vector<8x32xf32>
    %288 = arith.mulf %287, %286 : vector<8x32xf32>
    %cst_97 = arith.constant 1.000000e+00 : f32
    %289 = vector.broadcast %cst_97 : f32 to vector<8x32xf32>
    %290 = arith.subf %288, %289 : vector<8x32xf32>
    %291 = vector.extract_strided_slice %283 {offsets = [0, 96], sizes = [8, 32], strides = [1, 1]} : vector<8x128xf32> to vector<8x32xf32>
    %292 = arith.mulf %285, %270 : vector<8x32xf32>
    %293 = arith.mulf %284, %290 : vector<8x32xf32>
    %294 = arith.addf %292, %293 : vector<8x32xf32>
    %295 = math.tanh %294 : vector<8x32xf32>
    %296 = arith.mulf %291, %295 : vector<8x32xf32>
    %c3_i32_98 = arith.constant 3 : i32
    %c8_i32_99 = arith.constant 8 : i32
    %297 = arith.muli %c3_i32_98, %c8_i32_99 : i32
    %298 = tpu.assume_multiple %297, 8 : i32
    %299 = arith.index_cast %298 : i32 to index
    %c0_100 = arith.constant 0 : index
    %300 = vector.load %arg10[%299, %c0_100] : memref<64x128xf32, #tpu.memory_space<vmem>>, vector<8x128xf32>
    %cst_101 = arith.constant dense<0.000000e+00> : vector<8x128xf32>
    %301 = tpu.matmul %296, %218, %cst_101 {dimension_numbers = #tpu.dot_dimension_numbers<[1], [0], [0], [1], [0, 0, 1, 1], [], []>} : vector<8x32xf32>, vector<32x128xf32>, vector<8x128xf32> -> vector<8x128xf32>
    %302 = arith.addf %300, %301 : vector<8x128xf32>
    %303 = arith.negf %302 : vector<8x128xf32>
    %304 = math.exp %303 : vector<8x128xf32>
    %cst_102 = arith.constant 1.000000e+00 : f32
    %305 = vector.broadcast %cst_102 : f32 to vector<8x128xf32>
    %306 = arith.addf %305, %304 : vector<8x128xf32>
    %307 = arith.divf %305, %306 : vector<8x128xf32>
    %308 = vector.extract_strided_slice %307 {offsets = [0, 0], sizes = [8, 32], strides = [1, 1]} : vector<8x128xf32> to vector<8x32xf32>
    %309 = vector.extract_strided_slice %307 {offsets = [0, 32], sizes = [8, 32], strides = [1, 1]} : vector<8x128xf32> to vector<8x32xf32>
    %310 = vector.extract_strided_slice %307 {offsets = [0, 64], sizes = [8, 32], strides = [1, 1]} : vector<8x128xf32> to vector<8x32xf32>
    %cst_103 = arith.constant 2.000000e+00 : f32
    %311 = vector.broadcast %cst_103 : f32 to vector<8x32xf32>
    %312 = arith.mulf %311, %310 : vector<8x32xf32>
    %cst_104 = arith.constant 1.000000e+00 : f32
    %313 = vector.broadcast %cst_104 : f32 to vector<8x32xf32>
    %314 = arith.subf %312, %313 : vector<8x32xf32>
    %315 = vector.extract_strided_slice %307 {offsets = [0, 96], sizes = [8, 32], strides = [1, 1]} : vector<8x128xf32> to vector<8x32xf32>
    %316 = arith.mulf %309, %294 : vector<8x32xf32>
    %317 = arith.mulf %308, %314 : vector<8x32xf32>
    %318 = arith.addf %316, %317 : vector<8x32xf32>
    %319 = math.tanh %318 : vector<8x32xf32>
    %320 = arith.mulf %315, %319 : vector<8x32xf32>
    %c4_i32_105 = arith.constant 4 : i32
    %c8_i32_106 = arith.constant 8 : i32
    %321 = arith.muli %c4_i32_105, %c8_i32_106 : i32
    %322 = tpu.assume_multiple %321, 8 : i32
    %323 = arith.index_cast %322 : i32 to index
    %c0_107 = arith.constant 0 : index
    %324 = vector.load %arg10[%323, %c0_107] : memref<64x128xf32, #tpu.memory_space<vmem>>, vector<8x128xf32>
    %cst_108 = arith.constant dense<0.000000e+00> : vector<8x128xf32>
    %325 = tpu.matmul %320, %218, %cst_108 {dimension_numbers = #tpu.dot_dimension_numbers<[1], [0], [0], [1], [0, 0, 1, 1], [], []>} : vector<8x32xf32>, vector<32x128xf32>, vector<8x128xf32> -> vector<8x128xf32>
    %326 = arith.addf %324, %325 : vector<8x128xf32>
    %327 = arith.negf %326 : vector<8x128xf32>
    %328 = math.exp %327 : vector<8x128xf32>
    %cst_109 = arith.constant 1.000000e+00 : f32
    %329 = vector.broadcast %cst_109 : f32 to vector<8x128xf32>
    %330 = arith.addf %329, %328 : vector<8x128xf32>
    %331 = arith.divf %329, %330 : vector<8x128xf32>
    %332 = vector.extract_strided_slice %331 {offsets = [0, 0], sizes = [8, 32], strides = [1, 1]} : vector<8x128xf32> to vector<8x32xf32>
    %333 = vector.extract_strided_slice %331 {offsets = [0, 32], sizes = [8, 32], strides = [1, 1]} : vector<8x128xf32> to vector<8x32xf32>
    %334 = vector.extract_strided_slice %331 {offsets = [0, 64], sizes = [8, 32], strides = [1, 1]} : vector<8x128xf32> to vector<8x32xf32>
    %cst_110 = arith.constant 2.000000e+00 : f32
    %335 = vector.broadcast %cst_110 : f32 to vector<8x32xf32>
    %336 = arith.mulf %335, %334 : vector<8x32xf32>
    %cst_111 = arith.constant 1.000000e+00 : f32
    %337 = vector.broadcast %cst_111 : f32 to vector<8x32xf32>
    %338 = arith.subf %336, %337 : vector<8x32xf32>
    %339 = vector.extract_strided_slice %331 {offsets = [0, 96], sizes = [8, 32], strides = [1, 1]} : vector<8x128xf32> to vector<8x32xf32>
    %340 = arith.mulf %333, %318 : vector<8x32xf32>
    %341 = arith.mulf %332, %338 : vector<8x32xf32>
    %342 = arith.addf %340, %341 : vector<8x32xf32>
    %343 = math.tanh %342 : vector<8x32xf32>
    %344 = arith.mulf %339, %343 : vector<8x32xf32>
    %c5_i32_112 = arith.constant 5 : i32
    %c8_i32_113 = arith.constant 8 : i32
    %345 = arith.muli %c5_i32_112, %c8_i32_113 : i32
    %346 = tpu.assume_multiple %345, 8 : i32
    %347 = arith.index_cast %346 : i32 to index
    %c0_114 = arith.constant 0 : index
    %348 = vector.load %arg10[%347, %c0_114] : memref<64x128xf32, #tpu.memory_space<vmem>>, vector<8x128xf32>
    %cst_115 = arith.constant dense<0.000000e+00> : vector<8x128xf32>
    %349 = tpu.matmul %344, %218, %cst_115 {dimension_numbers = #tpu.dot_dimension_numbers<[1], [0], [0], [1], [0, 0, 1, 1], [], []>} : vector<8x32xf32>, vector<32x128xf32>, vector<8x128xf32> -> vector<8x128xf32>
    %350 = arith.addf %348, %349 : vector<8x128xf32>
    %351 = arith.negf %350 : vector<8x128xf32>
    %352 = math.exp %351 : vector<8x128xf32>
    %cst_116 = arith.constant 1.000000e+00 : f32
    %353 = vector.broadcast %cst_116 : f32 to vector<8x128xf32>
    %354 = arith.addf %353, %352 : vector<8x128xf32>
    %355 = arith.divf %353, %354 : vector<8x128xf32>
    %356 = vector.extract_strided_slice %355 {offsets = [0, 0], sizes = [8, 32], strides = [1, 1]} : vector<8x128xf32> to vector<8x32xf32>
    %357 = vector.extract_strided_slice %355 {offsets = [0, 32], sizes = [8, 32], strides = [1, 1]} : vector<8x128xf32> to vector<8x32xf32>
    %358 = vector.extract_strided_slice %355 {offsets = [0, 64], sizes = [8, 32], strides = [1, 1]} : vector<8x128xf32> to vector<8x32xf32>
    %cst_117 = arith.constant 2.000000e+00 : f32
    %359 = vector.broadcast %cst_117 : f32 to vector<8x32xf32>
    %360 = arith.mulf %359, %358 : vector<8x32xf32>
    %cst_118 = arith.constant 1.000000e+00 : f32
    %361 = vector.broadcast %cst_118 : f32 to vector<8x32xf32>
    %362 = arith.subf %360, %361 : vector<8x32xf32>
    %363 = vector.extract_strided_slice %355 {offsets = [0, 96], sizes = [8, 32], strides = [1, 1]} : vector<8x128xf32> to vector<8x32xf32>
    %364 = arith.mulf %357, %342 : vector<8x32xf32>
    %365 = arith.mulf %356, %362 : vector<8x32xf32>
    %366 = arith.addf %364, %365 : vector<8x32xf32>
    %367 = math.tanh %366 : vector<8x32xf32>
    %368 = arith.mulf %363, %367 : vector<8x32xf32>
    %c6_i32_119 = arith.constant 6 : i32
    %c8_i32_120 = arith.constant 8 : i32
    %369 = arith.muli %c6_i32_119, %c8_i32_120 : i32
    %370 = tpu.assume_multiple %369, 8 : i32
    %371 = arith.index_cast %370 : i32 to index
    %c0_121 = arith.constant 0 : index
    %372 = vector.load %arg10[%371, %c0_121] : memref<64x128xf32, #tpu.memory_space<vmem>>, vector<8x128xf32>
    %cst_122 = arith.constant dense<0.000000e+00> : vector<8x128xf32>
    %373 = tpu.matmul %368, %218, %cst_122 {dimension_numbers = #tpu.dot_dimension_numbers<[1], [0], [0], [1], [0, 0, 1, 1], [], []>} : vector<8x32xf32>, vector<32x128xf32>, vector<8x128xf32> -> vector<8x128xf32>
    %374 = arith.addf %372, %373 : vector<8x128xf32>
    %375 = arith.negf %374 : vector<8x128xf32>
    %376 = math.exp %375 : vector<8x128xf32>
    %cst_123 = arith.constant 1.000000e+00 : f32
    %377 = vector.broadcast %cst_123 : f32 to vector<8x128xf32>
    %378 = arith.addf %377, %376 : vector<8x128xf32>
    %379 = arith.divf %377, %378 : vector<8x128xf32>
    %380 = vector.extract_strided_slice %379 {offsets = [0, 0], sizes = [8, 32], strides = [1, 1]} : vector<8x128xf32> to vector<8x32xf32>
    %381 = vector.extract_strided_slice %379 {offsets = [0, 32], sizes = [8, 32], strides = [1, 1]} : vector<8x128xf32> to vector<8x32xf32>
    %382 = vector.extract_strided_slice %379 {offsets = [0, 64], sizes = [8, 32], strides = [1, 1]} : vector<8x128xf32> to vector<8x32xf32>
    %cst_124 = arith.constant 2.000000e+00 : f32
    %383 = vector.broadcast %cst_124 : f32 to vector<8x32xf32>
    %384 = arith.mulf %383, %382 : vector<8x32xf32>
    %cst_125 = arith.constant 1.000000e+00 : f32
    %385 = vector.broadcast %cst_125 : f32 to vector<8x32xf32>
    %386 = arith.subf %384, %385 : vector<8x32xf32>
    %387 = vector.extract_strided_slice %379 {offsets = [0, 96], sizes = [8, 32], strides = [1, 1]} : vector<8x128xf32> to vector<8x32xf32>
    %388 = arith.mulf %381, %366 : vector<8x32xf32>
    %389 = arith.mulf %380, %386 : vector<8x32xf32>
    %390 = arith.addf %388, %389 : vector<8x32xf32>
    %391 = math.tanh %390 : vector<8x32xf32>
    %392 = arith.mulf %387, %391 : vector<8x32xf32>
    %c7_i32_126 = arith.constant 7 : i32
    %c8_i32_127 = arith.constant 8 : i32
    %393 = arith.muli %c7_i32_126, %c8_i32_127 : i32
    %394 = tpu.assume_multiple %393, 8 : i32
    %395 = arith.index_cast %394 : i32 to index
    %c0_128 = arith.constant 0 : index
    %396 = vector.load %arg10[%395, %c0_128] : memref<64x128xf32, #tpu.memory_space<vmem>>, vector<8x128xf32>
    %cst_129 = arith.constant dense<0.000000e+00> : vector<8x128xf32>
    %397 = tpu.matmul %392, %218, %cst_129 {dimension_numbers = #tpu.dot_dimension_numbers<[1], [0], [0], [1], [0, 0, 1, 1], [], []>} : vector<8x32xf32>, vector<32x128xf32>, vector<8x128xf32> -> vector<8x128xf32>
    %398 = arith.addf %396, %397 : vector<8x128xf32>
    %399 = arith.negf %398 : vector<8x128xf32>
    %400 = math.exp %399 : vector<8x128xf32>
    %cst_130 = arith.constant 1.000000e+00 : f32
    %401 = vector.broadcast %cst_130 : f32 to vector<8x128xf32>
    %402 = arith.addf %401, %400 : vector<8x128xf32>
    %403 = arith.divf %401, %402 : vector<8x128xf32>
    %404 = vector.extract_strided_slice %403 {offsets = [0, 0], sizes = [8, 32], strides = [1, 1]} : vector<8x128xf32> to vector<8x32xf32>
    %405 = vector.extract_strided_slice %403 {offsets = [0, 32], sizes = [8, 32], strides = [1, 1]} : vector<8x128xf32> to vector<8x32xf32>
    %406 = vector.extract_strided_slice %403 {offsets = [0, 64], sizes = [8, 32], strides = [1, 1]} : vector<8x128xf32> to vector<8x32xf32>
    %cst_131 = arith.constant 2.000000e+00 : f32
    %407 = vector.broadcast %cst_131 : f32 to vector<8x32xf32>
    %408 = arith.mulf %407, %406 : vector<8x32xf32>
    %cst_132 = arith.constant 1.000000e+00 : f32
    %409 = vector.broadcast %cst_132 : f32 to vector<8x32xf32>
    %410 = arith.subf %408, %409 : vector<8x32xf32>
    %411 = vector.extract_strided_slice %403 {offsets = [0, 96], sizes = [8, 32], strides = [1, 1]} : vector<8x128xf32> to vector<8x32xf32>
    %412 = arith.mulf %405, %390 : vector<8x32xf32>
    %413 = arith.mulf %404, %410 : vector<8x32xf32>
    %414 = arith.addf %412, %413 : vector<8x32xf32>
    %415 = math.tanh %414 : vector<8x32xf32>
    %416 = arith.mulf %411, %415 : vector<8x32xf32>
    %c8_i32_133 = arith.constant 8 : i32
    %c0_134 = arith.constant 0 : index
    %c0_135 = arith.constant 0 : index
    %417 = vector.load %arg7[%c0_134, %c0_135] : memref<32x128xf32, #tpu.memory_space<vmem>>, vector<32x128xf32>
    %cst_136 = arith.constant dense<0.000000e+00> : vector<8x128xf32>
    %418 = tpu.matmul %416, %417, %cst_136 {dimension_numbers = #tpu.dot_dimension_numbers<[1], [0], [0], [1], [0, 0, 1, 1], [], []>} : vector<8x32xf32>, vector<32x128xf32>, vector<8x128xf32> -> vector<8x128xf32>
    %c0_137 = arith.constant 0 : index
    %c0_138 = arith.constant 0 : index
    %419 = vector.load %arg8[%c0_137, %c0_138] : memref<1x128xf32, #tpu.memory_space<vmem>>, vector<1x128xf32>
    %420 = vector.broadcast %419 : vector<1x128xf32> to vector<8x128xf32>
    %421 = arith.addf %418, %420 : vector<8x128xf32>
    %c0_139 = arith.constant 0 : index
    %c0_140 = arith.constant 0 : index
    %422 = vector.load %arg9[%c0_139, %c0_140] : memref<8x128xf32, #tpu.memory_space<vmem>>, vector<8x128xf32>
    tpu.vector_store %arg9[%c0_139, %c0_140], %421 {strides = array<i32>} : memref<8x128xf32, #tpu.memory_space<vmem>>, vector<8x128xf32>,
    return
  }
}

</mosaic_0001>

<bundles_post_ra>
// kernel: robustlog_forward.1
= control target key start
LH: loop header
LB: loop body
LE: loop exit
PB: predicated region body
PF: predicated region fallthrough
CT: control target
= control target key end

     0   :  { %14 = vsyncpa [#allocation5], 0  ;;  %s2751_s30 = smov [#allocation4]   ;;  %s3166_s0 = inlined_call_operand.vmem [shape: f32[64,4], index: 0, kind: input, shape index: {}]   ;;  %s3167_s1 = inlined_call_operand.vmem [shape: f32[4,128], index: 1, kind: input, shape index: {}]   ;;  %s3168_s2 = inlined_call_operand.vmem [shape: f32[32,128], index: 2, kind: input, shape index: {}]   ;;  %s3169_s3 = inlined_call_operand.vmem [shape: f32[1,128], index: 3, kind: input, shape index: {}]   ;;  %s3170_s4 = inlined_call_operand.vmem [shape: f32[32,128], index: 4, kind: input, shape index: {}]   ;;  %s3171_s5 = inlined_call_operand.vmem [shape: f32[32,128], index: 5, kind: input, shape index: {}]   ;;  %s3172_s6 = inlined_call_operand.vmem [shape: f32[1,128], index: 6, kind: input, shape index: {}]   ;;  %s3173_s7 = inlined_call_operand.hbm [shape: f32[32,128], index: 7, kind: input, shape index: {}]   ;;  %s3174_s8 = inlined_call_operand.vmem [shape: f32[1,128], index: 8, kind: input, shape index: {}]   ;;  %s3175_s9 = inlined_call_operand.vmem [shape: f32[8,128], index: 9, kind: output, shape index: {}]  }
   0x1   :  { %s34_s10 = sshll.u32 %s2751_s30, 4  ;;  %s2727_s13 = scalar_lea.hbm %s3173_s7, 512  ;;  %s35_s10 = int_to_ptr.vmem [resolvable:$true] %s34_s10 }
   0x2   :  { %p2728_p0 = scmp.ne.s32.totalorder %s3173_s7, %s2727_s13  ;;  %p2731_p1 = scmp.lt.u32.totalorder %s2727_s13, %s3173_s7 }
   0x4   :  { %p2733_p2 = pnand %p2731_p1, %p2728_p0 }
   0x6   :  { %2736 = shalt.err (!%p2733_p2)
}
   0x7   :  { %s2737_s18 = scalar_lea.vmem %s35_s10, 512  ;;  %p2742_p4 = scmp.lt.s32.totalorder %s35_s10, %s35_s10 }
   0x8   :  { %p2738_p3 = scmp.ne.s32.totalorder %s35_s10, %s2737_s18  ;;  %p2743_p5 = scmp.lt.s32.totalorder %s2737_s18, %s2737_s18 }
   0xa   :  { %p2744_p6 = por %p2743_p5, %p2742_p4 }
   0xc   :  { %p2745_p7 = pnand %p2744_p6, %p2738_p3 }
   0xe   :  { %2748 = shalt.err (!%p2745_p7)
}
   0xf   :  { %s2752_s19 = smov 128   ;;  %s2753_s20 = smov 8  }
  0x10   :  { %40 = dma.hbm_to_vmem [thread:$0]  %s3173_s7, 512, %s35_s10, [#allocation5], %s2752_s19, %s2752_s19, %s2753_s20  }
  0x11   :  { %2749 = dma.done.wait [#allocation5], 512  }
  0x12   :  { %2750 = vsyncadd [#allocation5], 4294966784  ;;  %v2754_v0 = vmov 0.0|0.0   ;;  %vm2755_vm0 = vmmov 0   ;;  %v2756_v1 = vmov 0.0   ;;  %vm91_vm1 = vcmask 1043456  }
  0x13   :  { %2513 = vmatprep.subr.bf16.mxu1 %v2754_v0  ;;  %2314 = vmatprep.mubr.msk.f32.mxu1 %vm2755_vm0, %v2756_v1  ;;  %vm66_vm2 = vcmask 31744   ;;  %v47_v2 = vld [vmem:[%s3168_s2] sm:$0xff]  ;;  %v48_v3 = vld [vmem:[%s3168_s2 + $0x8] sm:$0xff]  ;;  %v49_v8 = vld [vmem:[%s3168_s2 + $0x10] sm:$0xff]  ;;  %s2757_s15 = smov 64   ;;  %vm209_vm3 = vcmask 261120  }
  0x14   :  { %v46_v4 = vld [vmem:[%s3167_s1] sm:$0xf]  ;;  %v2833_v5 = vpack.c.bf16 %v48_v3, %v47_v2  ;;  %v53_v7 = vld [vmem:[%s3166_s0 + $0x8] sm:$0xff]  ;;  %v50_v9 = vld [vmem:[%s3168_s2 + $0x18] sm:$0xff] }
  0x15   :  { %2292 = vmatprep.subr.msk.mxu0 %vm91_vm1, %v46_v4  ;;  %v52_v6 = vld [vmem:[%s3166_s0] sm:$0xff]  ;;  %v2850_v10 = vpack.c.bf16 %v50_v9, %v49_v8  ;;  %v54_v48 = vld [vmem:[%s3166_s0 + $0x10] sm:$0xff]  ;;  %v55_v49 = vld [vmem:[%s3166_s0 + $0x18] sm:$0xff] }
  0x16   :  { %2293 = vmatpush3.msk.msra.mxu0 %vm91_vm1, %v46_v4  ;;  %2294 = vmatprep.mubr.msk.f32.mxu0 %vm66_vm2, %v52_v6  ;;  %v2870_v12 = vld [vmem:[%s3169_s3] ss:$0 sm:$0xff]  ;;  %s2758_s3 = smov 32   ;;  %v57_v51 = vld [vmem:[%s3166_s0 + $0x28] sm:$0xff]  ;;  %v58_v52 = vld [vmem:[%s3166_s0 + $0x30] sm:$0xff] }
  0x17   :  { %2515 = vmatpush3.bf16.msra.mxu1 %v2833_v5  ;;  %2295 = vmatmul.mubr.msk.f32.vlgmr.msra.gmra.mrb[0].mxu0 %vm66_vm2, %v53_v7  ;;  %v56_v50 = vld [vmem:[%s3166_s0 + $0x20] sm:$0xff]  ;;  %v59_v53 = vld [vmem:[%s3166_s0 + $0x38] sm:$0xff] }
  0x18   :  { %2516 = vmatprep.subr.bf16.mxu1 %v2754_v0  ;;  %2525 = vmatprep.subr.bf16.mxu0 %v2754_v0 }
  0x19   :  { %2527 = vmatpush3.bf16.msra.mxu0 %v2833_v5  ;;  %2297 = vmatprep.mubr.msk.f32.mxu0 %vm66_vm2, %v54_v48 }
  0x1a   :  { %2528 = vmatprep.subr.bf16.mxu0 %v2754_v0 }
  0x1b   :  { %2518 = vmatpush3.bf16.msra.mxu1 %v2850_v10  ;;  %2298 = vmatmul.mubr.msk.f32.gmra.mrb[2].mxu0 %vm66_vm2, %v55_v49 }
  0x1c   :  { %2519 = vmatprep.subr.bf16.mxu1 %v2754_v0  ;;  %2300 = vmatprep.mubr.msk.f32.mxu0 %vm66_vm2, %v56_v50 }
  0x1d   :  { %2530 = vmatpush3.bf16.msra.mxu0 %v2850_v10 }
  0x1e   :  { %2315 = vmatmul.mubr.f32.vlgmr.msra.gmra.mrb[0].mxu1 %v2756_v1  ;;  %2537 = vmatprep.subr.bf16.mxu0 %v2754_v0 }
  0x1f   :  { %2521 = vmatpush3.bf16.msra.mxu1 %v2833_v5  ;;  %2325 = vmatprep.mubr.msk.f32.mxu1 %vm2755_vm0, %v2756_v1 }
  0x20   :  { %2522 = vmatprep.subr.bf16.mxu1 %v2754_v0  ;;  %2301 = vmatmul.mubr.msk.f32.gmra.mrb[4].mxu0 %vm66_vm2, %v57_v51 }
  0x21   :  { %2303 = vmatprep.mubr.msk.f32.mxu0 %vm66_vm2, %v58_v52 }
  0x23   :  { %2524 = vmatpush3.bf16.msra.mxu1 %v2850_v10 }
  0x24   :  { %2531 = vmatprep.subr.bf16.mxu1 %v2754_v0  ;;  %2304 = vmatmul.mubr.msk.f32.gmra.mrb[6].mxu0 %vm66_vm2, %v59_v53 }
  0x25   :  { %2336 = vmatprep.mubr.msk.f32.mxu0 %vm2755_vm0, %v2756_v1 }
  0xea   :  { %v2296_v11 = vpop.f32.mrb[0].mxu0 }
  0xeb   :  { %v161_v13 = vpop.f32.mrb[1].mxu0  ;;  %v167_v33 = vadd.f32 %v2296_v11, %v2870_v12 }
  0xec   :  { %v162_v14 = vadd.f32 %v2870_v12, %v161_v13 }
  0xee   :  { %v2299_v57 = vpop.f32.mrb[2].mxu0 }
  0xef   :  { %v171_v58 = vpop.f32.mrb[3].mxu0 }
  0xf0   :  { %v172_v2 = vadd.f32 %v2870_v12, %v171_v58 }
  0xf1   :  { %v279_v15 = vpop.f32.mrb[0].mxu1 }
  0xf2   :  { %v283_v16 = vadd.f32 %v279_v15, %v162_v14  ;;  %v2316_v17 = vpop.f32.mrb[1].mxu1 }
  0xf3   :  { %v2916_v59 = vpop.f32.mrb[4].mxu0 }
  0xf4   :  { %v2129_v18 = vmul.f32 -1.442695, %v283_v16  ;;  %v2918_v60 = vpop.f32.mrb[5].mxu0 }
  0xf6   :  { %2631 = vpow2.f32 %v2129_v18 }
  0xf7   :  { %v2920_v61 = vpop.f32.mrb[6].mxu0 }
  0xf8   :  { %v2922_v62 = vpop.f32.mrb[7].mxu0 }
 0x100   :  { %v2632_v19 = vpop.eup %2631 }
 0x101   :  { %v287_v20 = vadd.f32 1.0, %v2632_v19 }
 0x103   :  { %2633 = vrcp.f32 %v287_v20 }
 0x10d   :  { %v2634_v21 = vpop.eup %2633 }
 0x10e   :  { %v290_v22 = vmul.f32 2.0, %v2634_v21  ;;  %v292_v26 = vmul.f32 0.0, %v2634_v21 }
 0x110   :  { %v2130_v23 = vadd.f32 -1.0, %v290_v22 }
 0x112   :  { %294 = vrot.lane.b32.xlu0 %v2130_v23, %s2757_s15 }
 0x184   :  { %v295_v24 = vpop.permute.xlu0 %294 }
 0x185   :  { %v297_v25 = vmul.f32 %v2634_v21, %v295_v24  ;;  %v177_v24 = vadd.f32 %v2299_v57, %v2870_v12 }
 0x187   :  { %299 = vrot.lane.b32.xlu0 %v297_v25, %s2758_s3 }
 0x1f9   :  { %v300_v27 = vpop.permute.xlu0 %299 }
 0x1fa   :  { %v302_v28 = vadd.f32 %v300_v27, %v292_v26 }
 0x1fc   :  { %2635 = vtanh.f32 %v302_v28 }
 0x206   :  { %v2636_v29 = vpop.eup %2635 }
 0x207   :  { %305 = vrot.lane.b32.xlu1 %v2636_v29, %s2757_s15 }
 0x279   :  { %v306_v30 = vpop.permute.xlu1 %305 }
 0x27a   :  { %v308_v31 = vmul.f32 %v2634_v21, %v306_v30 }
 0x27c   :  { %310 = vrot.lane.b32.xlu1 %v308_v31, %s2758_s3 }
 0x2ee   :  { %v311_v32 = vpop.permute.xlu1 %310 }
 0x2ef   :  { %313 = vst.msk [vmem:[#allocation3] sm:$0xff] %vm209_vm3, %v311_v32  ;;  %2326 = vmatmul.mubr.msk.f32.vlgmr.msra.gmra.mrb[2].mxu1 %vm209_vm3, %v311_v32 }
 0x2f0   :  { %2533 = vmatpush3.bf16.msra.mxu1 %v2833_v5  ;;  %2347 = vmatprep.mubr.msk.f32.mxu1 %vm2755_vm0, %v2756_v1 }
 0x2f1   :  { %2534 = vmatprep.subr.bf16.mxu1 %v2754_v0 }
 0x2f4   :  { %2536 = vmatpush3.bf16.msra.mxu1 %v2850_v10 }
 0x2f5   :  { %2543 = vmatprep.subr.bf16.mxu1 %v2754_v0 }
 0x3c2   :  { %v384_v34 = vpop.f32.mrb[2].mxu1 }
 0x3c3   :  { %v388_v35 = vadd.f32 %v384_v34, %v167_v33  ;;  %v2327_v36 = vpop.f32.mrb[3].mxu1 }
 0x3c5   :  { %v2132_v37 = vmul.f32 -1.442695, %v388_v35 }
 0x3c7   :  { %2637 = vpow2.f32 %v2132_v37 }
 0x3d1   :  { %v2638_v38 = vpop.eup %2637 }
 0x3d2   :  { %v392_v39 = vadd.f32 1.0, %v2638_v38 }
 0x3d4   :  { %2639 = vrcp.f32 %v392_v39 }
 0x3de   :  { %v2640_v40 = vpop.eup %2639 }
 0x3df   :  { %v395_v41 = vmul.f32 2.0, %v2640_v40  ;;  %v397_v45 = vmul.f32 %v2640_v40, %v302_v28 }
 0x3e1   :  { %v2133_v42 = vadd.f32 -1.0, %v395_v41 }
 0x3e3   :  { %399 = vrot.lane.b32.xlu0 %v2133_v42, %s2757_s15 }
 0x455   :  { %v400_v43 = vpop.permute.xlu0 %399 }
 0x456   :  { %v402_v44 = vmul.f32 %v2640_v40, %v400_v43  ;;  %v182_v43 = vadd.f32 %v2870_v12, %v2918_v60 }
 0x458   :  { %404 = vrot.lane.b32.xlu1 %v402_v44, %s2758_s3 }
 0x4ca   :  { %v405_v46 = vpop.permute.xlu1 %404 }
 0x4cb   :  { %v407_v47 = vadd.f32 %v405_v46, %v397_v45 }
 0x4cd   :  { %2641 = vtanh.f32 %v407_v47 }
 0x4d7   :  { %v2642_v54 = vpop.eup %2641 }
 0x4d8   :  { %410 = vrot.lane.b32.xlu0 %v2642_v54, %s2757_s15 }
 0x54a   :  { %v411_v55 = vpop.permute.xlu0 %410 }
 0x54b   :  { %v413_v56 = vmul.f32 %v2640_v40, %v411_v55 }
 0x54d   :  { %415 = vrot.lane.b32.xlu1 %v413_v56, %s2758_s3 }
 0x5bf   :  { %v416_v63 = vpop.permute.xlu1 %415 }
 0x5c0   :  { %419 = vst.msk [vmem:[#allocation3 + $0x8] sm:$0xff] %vm209_vm3, %v416_v63  ;;  %2337 = vmatmul.mubr.msk.f32.vlgmr.msra.gmra.mrb[8].mxu0 %vm209_vm3, %v416_v63 }
 0x5c1   :  { %2539 = vmatpush3.bf16.msra.mxu0 %v2833_v5  ;;  %2358 = vmatprep.mubr.msk.f32.mxu0 %vm2755_vm0, %v2756_v1 }
 0x5c2   :  { %2540 = vmatprep.subr.bf16.mxu0 %v2754_v0 }
 0x5c5   :  { %2542 = vmatpush3.bf16.msra.mxu0 %v2850_v10 }
 0x5c6   :  { %2549 = vmatprep.subr.bf16.mxu0 %v2754_v0 }
 0x693   :  { %v490_v3 = vpop.f32.mrb[8].mxu0 }
 0x694   :  { %v494_v4 = vadd.f32 %v490_v3, %v172_v2  ;;  %v2338_v6 = vpop.f32.mrb[9].mxu0  ;;  %v187_v3 = vadd.f32 %v2916_v59, %v2870_v12 }
 0x696   :  { %v2135_v7 = vmul.f32 -1.442695, %v494_v4 }
 0x698   :  { %2643 = vpow2.f32 %v2135_v7 }
 0x6a2   :  { %v2644_v8 = vpop.eup %2643 }
 0x6a3   :  { %v498_v9 = vadd.f32 1.0, %v2644_v8 }
 0x6a5   :  { %2645 = vrcp.f32 %v498_v9 }
 0x6af   :  { %v2646_v11 = vpop.eup %2645 }
 0x6b0   :  { %v501_v13 = vmul.f32 2.0, %v2646_v11  ;;  %v503_v17 = vmul.f32 %v2646_v11, %v407_v47 }
 0x6b2   :  { %v2136_v14 = vadd.f32 -1.0, %v501_v13 }
 0x6b4   :  { %505 = vrot.lane.b32.xlu0 %v2136_v14, %s2757_s15 }
 0x726   :  { %v506_v15 = vpop.permute.xlu0 %505 }
 0x727   :  { %v508_v16 = vmul.f32 %v2646_v11, %v506_v15 }
 0x729   :  { %510 = vrot.lane.b32.xlu1 %v508_v16, %s2758_s3 }
 0x79b   :  { %v511_v18 = vpop.permute.xlu1 %510 }
 0x79c   :  { %v513_v19 = vadd.f32 %v511_v18, %v503_v17  ;;  %v1056_v18 = vld [vmem:[%s3170_s4] sm:$0xff] }
 0x79e   :  { %2647 = vtanh.f32 %v513_v19 }
 0x7a8   :  { %v2648_v20 = vpop.eup %2647 }
 0x7a9   :  { %516 = vrot.lane.b32.xlu0 %v2648_v20, %s2757_s15 }
 0x81b   :  { %v517_v21 = vpop.permute.xlu0 %516 }
 0x81c   :  { %v519_v22 = vmul.f32 %v2646_v11, %v517_v21 }
 0x81e   :  { %521 = vrot.lane.b32.xlu1 %v519_v22, %s2758_s3 }
 0x890   :  { %v522_v23 = vpop.permute.xlu1 %521 }
 0x891   :  { %525 = vst.msk [vmem:[#allocation3 + $0x10] sm:$0xff] %vm209_vm3, %v522_v23  ;;  %2348 = vmatmul.mubr.msk.f32.vlgmr.msra.gmra.mrb[4].mxu1 %vm209_vm3, %v522_v23 }
 0x892   :  { %2545 = vmatpush3.bf16.msra.mxu1 %v2833_v5  ;;  %2369 = vmatprep.mubr.msk.f32.mxu1 %vm2755_vm0, %v2756_v1 }
 0x893   :  { %2546 = vmatprep.subr.bf16.mxu1 %v2754_v0 }
 0x896   :  { %2548 = vmatpush3.bf16.msra.mxu1 %v2850_v10 }
 0x897   :  { %2555 = vmatprep.subr.bf16.mxu1 %v2754_v0 }
 0x964   :  { %v596_v25 = vpop.f32.mrb[4].mxu1 }
 0x965   :  { %v600_v26 = vadd.f32 %v596_v25, %v177_v24  ;;  %v2349_v27 = vpop.f32.mrb[5].mxu1  ;;  %v1058_v24 = vld [vmem:[%s3170_s4 + $0x10] sm:$0xff]  ;;  %v1059_v25 = vld [vmem:[%s3170_s4 + $0x18] sm:$0xff] }
 0x967   :  { %v2138_v28 = vmul.f32 -1.442695, %v600_v26  ;;  %v2565_v26 = vpack.c.bf16 %v1059_v25, %v1058_v24 }
 0x969   :  { %2649 = vpow2.f32 %v2138_v28  ;;  %v1065_v28 = vld [vmem:[#allocation3] sm:$0xff] }
 0x973   :  { %v2650_v29 = vpop.eup %2649 }
 0x974   :  { %v604_v30 = vadd.f32 1.0, %v2650_v29  ;;  %v1066_v29 = vld [vmem:[#allocation3 + $0x8] sm:$0xff] }
 0x976   :  { %2651 = vrcp.f32 %v604_v30  ;;  %v1067_v30 = vld [vmem:[#allocation3 + $0x10] sm:$0xff] }
 0x980   :  { %v2652_v31 = vpop.eup %2651 }
 0x981   :  { %v607_v32 = vmul.f32 2.0, %v2652_v31  ;;  %v609_v36 = vmul.f32 %v2652_v31, %v513_v19  ;;  %v1057_v19 = vld [vmem:[%s3170_s4 + $0x8] sm:$0xff] }
 0x982   :  { %v2561_v20 = vpack.c.bf16 %v1057_v19, %v1056_v18 }
 0x983   :  { %v2139_v33 = vadd.f32 -1.0, %v607_v32 }
 0x985   :  { %611 = vrot.lane.b32.xlu0 %v2139_v33, %s2757_s15 }
 0x9f7   :  { %v612_v34 = vpop.permute.xlu0 %611 }
 0x9f8   :  { %v614_v35 = vmul.f32 %v2652_v31, %v612_v34  ;;  %v192_v34 = vadd.f32 %v2870_v12, %v2922_v62 }
 0x9fa   :  { %616 = vrot.lane.b32.xlu1 %v614_v35, %s2758_s3 }
 0xa6c   :  { %v617_v37 = vpop.permute.xlu1 %616 }
 0xa6d   :  { %v619_v38 = vadd.f32 %v617_v37, %v609_v36 }
 0xa6f   :  { %2653 = vtanh.f32 %v619_v38 }
 0xa79   :  { %v2654_v39 = vpop.eup %2653 }
 0xa7a   :  { %622 = vrot.lane.b32.xlu0 %v2654_v39, %s2757_s15 }
 0xaec   :  { %v623_v40 = vpop.permute.xlu0 %622 }
 0xaed   :  { %v625_v41 = vmul.f32 %v2652_v31, %v623_v40 }
 0xaef   :  { %627 = vrot.lane.b32.xlu1 %v625_v41, %s2758_s3 }
 0xb61   :  { %v628_v42 = vpop.permute.xlu1 %627 }
 0xb62   :  { %631 = vst.msk [vmem:[#allocation3 + $0x18] sm:$0xff] %vm209_vm3, %v628_v42  ;;  %2359 = vmatmul.mubr.msk.f32.vlgmr.msra.gmra.mrb[10].mxu0 %vm209_vm3, %v628_v42 }
 0xb63   :  { %2551 = vmatpush3.bf16.msra.mxu0 %v2833_v5  ;;  %2380 = vmatprep.mubr.msk.f32.mxu0 %vm2755_vm0, %v2756_v1 }
 0xb64   :  { %2552 = vmatprep.subr.bf16.mxu0 %v2754_v0 }
 0xb67   :  { %2554 = vmatpush3.bf16.msra.mxu0 %v2850_v10 }
 0xb68   :  { %2562 = vmatprep.subr.bf16.mxu0 %v2561_v20 }
 0xb69   :  { %v1068_v31 = vld [vmem:[#allocation3 + $0x18] sm:$0xff] }
 0xc35   :  { %v702_v44 = vpop.f32.mrb[10].mxu0 }
 0xc36   :  { %v706_v45 = vadd.f32 %v702_v44, %v182_v43  ;;  %v2360_v46 = vpop.f32.mrb[11].mxu0 }
 0xc38   :  { %v2141_v47 = vmul.f32 -1.442695, %v706_v45 }
 0xc3a   :  { %2655 = vpow2.f32 %v2141_v47 }
 0xc44   :  { %v2656_v48 = vpop.eup %2655 }
 0xc45   :  { %v710_v49 = vadd.f32 1.0, %v2656_v48 }
 0xc47   :  { %2657 = vrcp.f32 %v710_v49 }
 0xc51   :  { %v2658_v50 = vpop.eup %2657 }
 0xc52   :  { %v713_v51 = vmul.f32 2.0, %v2658_v50  ;;  %v715_v55 = vmul.f32 %v2658_v50, %v619_v38 }
 0xc54   :  { %v2142_v52 = vadd.f32 -1.0, %v713_v51 }
 0xc56   :  { %717 = vrot.lane.b32.xlu0 %v2142_v52, %s2757_s15 }
 0xcc8   :  { %v718_v53 = vpop.permute.xlu0 %717 }
 0xcc9   :  { %v720_v54 = vmul.f32 %v2658_v50, %v718_v53 }
 0xccb   :  { %722 = vrot.lane.b32.xlu1 %v720_v54, %s2758_s3 }
 0xd3d   :  { %v723_v56 = vpop.permute.xlu1 %722 }
 0xd3e   :  { %v725_v57 = vadd.f32 %v723_v56, %v715_v55  ;;  %v1060_v55 = vld [vmem:[%s3171_s5] sm:$0xff]  ;;  %v1061_v56 = vld [vmem:[%s3171_s5 + $0x8] sm:$0xff] }
 0xd40   :  { %2659 = vtanh.f32 %v725_v57 }
 0xd4a   :  { %v2660_v58 = vpop.eup %2659 }
 0xd4b   :  { %728 = vrot.lane.b32.xlu0 %v2660_v58, %s2757_s15  ;;  %v1062_v58 = vld [vmem:[%s3171_s5 + $0x10] sm:$0xff] }
 0xdbd   :  { %v729_v60 = vpop.permute.xlu0 %728 }
 0xdbe   :  { %v731_v63 = vmul.f32 %v2658_v50, %v729_v60  ;;  %v1063_v60 = vld [vmem:[%s3171_s5 + $0x18] sm:$0xff] }
 0xdc0   :  { %733 = vrot.lane.b32.xlu1 %v731_v63, %s2758_s3  ;;  %v3032_v63 = vpack.c.bf16 %v1063_v60, %v1062_v58 }
 0xe32   :  { %v734_v2 = vpop.permute.xlu1 %733 }
 0xe33   :  { %737 = vst.msk [vmem:[#allocation3 + $0x20] sm:$0xff] %vm209_vm3, %v734_v2  ;;  %2370 = vmatmul.mubr.msk.f32.vlgmr.msra.gmra.mrb[6].mxu1 %vm209_vm3, %v734_v2 }
 0xe34   :  { %2557 = vmatpush3.bf16.msra.mxu1 %v2833_v5  ;;  %2391 = vmatprep.mubr.msk.f32.mxu1 %vm2755_vm0, %v2756_v1 }
 0xe35   :  { %2558 = vmatprep.subr.bf16.mxu1 %v2754_v0 }
 0xe38   :  { %2560 = vmatpush3.bf16.msra.mxu1 %v2850_v10 }
 0xe39   :  { %2569 = vmatprep.subr.bf16.mxu1 %v2754_v0 }
 0xe3a   :  { %v1069_v32 = vld [vmem:[#allocation3 + $0x20] sm:$0xff] }
 0xf06   :  { %v808_v4 = vpop.f32.mrb[6].mxu1 }
 0xf07   :  { %v812_v6 = vadd.f32 %v808_v4, %v187_v3  ;;  %v2371_v7 = vpop.f32.mrb[7].mxu1 }
 0xf08   :  { %v197_v7 = vadd.f32 %v2920_v61, %v2870_v12 }
 0xf09   :  { %v2144_v8 = vmul.f32 -1.442695, %v812_v6 }
 0xf0b   :  { %2661 = vpow2.f32 %v2144_v8 }
 0xf15   :  { %v2662_v9 = vpop.eup %2661 }
 0xf16   :  { %v816_v11 = vadd.f32 1.0, %v2662_v9 }
 0xf18   :  { %2663 = vrcp.f32 %v816_v11 }
 0xf22   :  { %v2664_v5 = vpop.eup %2663 }
 0xf23   :  { %v819_v13 = vmul.f32 2.0, %v2664_v5  ;;  %v821_v16 = vmul.f32 %v2664_v5, %v725_v57  ;;  %v3022_v57 = vpack.c.bf16 %v1061_v56, %v1060_v55 }
 0xf25   :  { %v2145_v14 = vadd.f32 -1.0, %v819_v13 }
 0xf27   :  { %823 = vrot.lane.b32.xlu0 %v2145_v14, %s2757_s15 }
 0xf99   :  { %v824_v15 = vpop.permute.xlu0 %823 }
 0xf9a   :  { %v826_v10 = vmul.f32 %v2664_v5, %v824_v15 }
 0xf9c   :  { %828 = vrot.lane.b32.xlu1 %v826_v10, %s2758_s3 }
0x100e   :  { %v829_v17 = vpop.permute.xlu1 %828 }
0x100f   :  { %v831_v59 = vadd.f32 %v829_v17, %v821_v16 }
0x1011   :  { %2665 = vtanh.f32 %v831_v59 }
0x101b   :  { %v2666_v21 = vpop.eup %2665 }
0x101c   :  { %834 = vrot.lane.b32.xlu0 %v2666_v21, %s2757_s15 }
0x108e   :  { %v835_v22 = vpop.permute.xlu0 %834 }
0x108f   :  { %v837_v23 = vmul.f32 %v2664_v5, %v835_v22  ;;  %v3058_v5 = vld [vmem:[%s3172_s6] ss:$0 sm:$0xff] }
0x1091   :  { %839 = vrot.lane.b32.xlu1 %v837_v23, %s2758_s3 }
0x1103   :  { %v840_v27 = vpop.permute.xlu1 %839 }
0x1104   :  { %843 = vst.msk [vmem:[#allocation3 + $0x28] sm:$0xff] %vm209_vm3, %v840_v27  ;;  %2381 = vmatmul.mubr.msk.f32.vlgmr.msra.gmra.mrb[12].mxu0 %vm209_vm3, %v840_v27 }
0x1105   :  { %2564 = vmatpush3.bf16.msra.mxu0 %v2561_v20  ;;  %2402 = vmatprep.mubr.msk.f32.mxu0 %vm209_vm3, %v1065_v28 }
0x1106   :  { %2566 = vmatprep.subr.bf16.mxu0 %v2565_v26 }
0x1109   :  { %2568 = vmatpush3.bf16.msra.mxu0 %v2565_v26 }
0x110a   :  { %2581 = vmatprep.subr.bf16.mxu0 %v2754_v0 }
0x110b   :  { %v1070_v33 = vld [vmem:[#allocation3 + $0x28] sm:$0xff] }
0x110c   :  { %2403 = vmatmul.mubr.msk.f32.vlgmr.msra.gmra.mrb[14].mxu0 %vm209_vm3, %v1066_v29 }
0x110d   :  { %2405 = vmatprep.mubr.msk.f32.mxu0 %vm209_vm3, %v1067_v30  ;;  %2583 = vmatpush3.bf16.msra.mxu0 %v3022_v57 }
0x110e   :  { %2584 = vmatprep.subr.bf16.mxu0 %v2754_v0 }
0x1110   :  { %2406 = vmatmul.mubr.msk.f32.gmra.mrb[16].mxu0 %vm209_vm3, %v1068_v31 }
0x1111   :  { %2408 = vmatprep.mubr.msk.f32.mxu0 %vm209_vm3, %v1069_v32  ;;  %2586 = vmatpush3.bf16.msra.mxu0 %v3032_v63 }
0x1112   :  { %2593 = vmatprep.subr.bf16.mxu0 %v2754_v0 }
0x1114   :  { %2409 = vmatmul.mubr.msk.f32.gmra.mrb[18].mxu0 %vm209_vm3, %v1070_v33 }
0x11d7   :  { %v914_v35 = vpop.f32.mrb[12].mxu0 }
0x11d8   :  { %v918_v36 = vadd.f32 %v914_v35, %v192_v34  ;;  %v2382_v37 = vpop.f32.mrb[13].mxu0 }
0x11da   :  { %v2147_v38 = vmul.f32 -1.442695, %v918_v36 }
0x11dc   :  { %2667 = vpow2.f32 %v2147_v38 }
0x11df   :  { %v3000_v39 = vpop.f32.mrb[14].mxu0 }
0x11e0   :  { %v1169_v40 = vpop.f32.mrb[15].mxu0 }
0x11e1   :  { %v1170_v13 = vadd.f32 %v3058_v5, %v1169_v40 }
0x11e3   :  { %v3002_v41 = vpop.f32.mrb[16].mxu0 }
0x11e4   :  { %v3004_v42 = vpop.f32.mrb[17].mxu0 }
0x11e6   :  { %v2668_v43 = vpop.eup %2667 }
0x11e7   :  { %v922_v44 = vadd.f32 1.0, %v2668_v43  ;;  %v3006_v45 = vpop.f32.mrb[18].mxu0 }
0x11e8   :  { %v3008_v46 = vpop.f32.mrb[19].mxu0 }
0x11e9   :  { %2669 = vrcp.f32 %v922_v44 }
0x11f3   :  { %v2670_v62 = vpop.eup %2669 }
0x11f4   :  { %v925_v47 = vmul.f32 2.0, %v2670_v62  ;;  %v927_v51 = vmul.f32 %v2670_v62, %v831_v59 }
0x11f6   :  { %v2148_v48 = vadd.f32 -1.0, %v925_v47 }
0x11f8   :  { %929 = vrot.lane.b32.xlu0 %v2148_v48, %s2757_s15 }
0x126a   :  { %v930_v49 = vpop.permute.xlu0 %929 }
0x126b   :  { %v932_v50 = vmul.f32 %v2670_v62, %v930_v49 }
0x126d   :  { %934 = vrot.lane.b32.xlu1 %v932_v50, %s2758_s3 }
0x12df   :  { %v935_v52 = vpop.permute.xlu1 %934 }
0x12e0   :  { %v3012_v53 = vadd.f32 %v935_v52, %v927_v51 }
0x12e2   :  { %2671 = vtanh.f32 %v3012_v53 }
0x12ec   :  { %v2672_v54 = vpop.eup %2671 }
0x12ed   :  { %940 = vrot.lane.b32.xlu0 %v2672_v54, %s2757_s15 }
0x135f   :  { %v941_v2 = vpop.permute.xlu0 %940 }
0x1360   :  { %v943_v3 = vmul.f32 %v2670_v62, %v941_v2  ;;  %v1175_v62 = vadd.f32 %v3000_v39, %v3058_v5 }
0x1362   :  { %945 = vrot.lane.b32.xlu1 %v943_v3, %s2758_s3 }
0x13d4   :  { %v946_v4 = vpop.permute.xlu1 %945 }
0x13d5   :  { %949 = vst.msk [vmem:[#allocation3 + $0x30] sm:$0xff] %vm209_vm3, %v946_v4  ;;  %2392 = vmatmul.mubr.msk.f32.vlgmr.msra.gmra.mrb[8].mxu1 %vm209_vm3, %v946_v4 }
0x13d6   :  { %2571 = vmatpush3.bf16.msra.mxu1 %v3022_v57  ;;  %2422 = vmatprep.mubr.msk.f32.mxu1 %vm2755_vm0, %v2756_v1 }
0x13d7   :  { %2572 = vmatprep.subr.bf16.mxu1 %v2754_v0 }
0x13da   :  { %2574 = vmatpush3.bf16.msra.mxu1 %v3032_v63 }
0x13db   :  { %2575 = vmatprep.subr.bf16.mxu1 %v2754_v0 }
0x13dc   :  { %v1071_v6 = vld [vmem:[#allocation3 + $0x30] sm:$0xff] }
0x13dd   :  { %2423 = vmatmul.mubr.f32.vlgmr.msra.gmra.mrb[10].mxu1 %v2756_v1  ;;  %2411 = vmatprep.mubr.msk.f32.mxu0 %vm209_vm3, %v1071_v6 }
0x13de   :  { %2577 = vmatpush3.bf16.msra.mxu1 %v3022_v57  ;;  %2433 = vmatprep.mubr.msk.f32.mxu1 %vm2755_vm0, %v2756_v1 }
0x13df   :  { %2578 = vmatprep.subr.bf16.mxu1 %v2754_v0 }
0x13e2   :  { %2580 = vmatpush3.bf16.msra.mxu1 %v3032_v63 }
0x13e3   :  { %2587 = vmatprep.subr.bf16.mxu1 %v2754_v0 }
0x14a8   :  { %v1020_v8 = vpop.f32.mrb[8].mxu1 }
0x14a9   :  { %v1024_v9 = vadd.f32 %v1020_v8, %v197_v7  ;;  %v2393_v11 = vpop.f32.mrb[9].mxu1 }
0x14ab   :  { %v2150_v21 = vmul.f32 -1.442695, %v1024_v9 }
0x14b0   :  { %v1283_v14 = vpop.f32.mrb[10].mxu1 }
0x14b1   :  { %v1287_v15 = vadd.f32 %v1283_v14, %v1170_v13  ;;  %v2424_v10 = vpop.f32.mrb[11].mxu1  ;;  %v1180_v14 = vadd.f32 %v3058_v5, %v3004_v42 }
0x14b3   :  { %v2161_v16 = vmul.f32 -1.442695, %v1287_v15 }
0x14b5   :  { %2673 = vpow2.f32 %v2161_v16 }
0x14bf   :  { %v2674_v17 = vpop.eup %2673 }
0x14c0   :  { %v1291_v59 = vadd.f32 1.0, %v2674_v17 }
0x14c2   :  { %2675 = vrcp.f32 %v1291_v59 }
0x14c3   :  { %2677 = vpow2.f32 %v2150_v21 }
0x14cc   :  { %v2676_v18 = vpop.eup %2675 }
0x14cd   :  { %v1294_v12 = vmul.f32 2.0, %v2676_v18  ;;  %v2678_v22 = vpop.eup %2677  ;;  %v1296_v24 = vmul.f32 0.0, %v2676_v18 }
0x14ce   :  { %v1028_v23 = vadd.f32 1.0, %v2678_v22 }
0x14cf   :  { %v2162_v61 = vadd.f32 -1.0, %v1294_v12 }
0x14d0   :  { %2679 = vrcp.f32 %v1028_v23 }
0x14d1   :  { %1298 = vrot.lane.b32.xlu0 %v2162_v61, %s2757_s15 }
0x14da   :  { %v2680_v27 = vpop.eup %2679 }
0x14db   :  { %v1031_v28 = vmul.f32 2.0, %v2680_v27  ;;  %v1033_v36 = vmul.f32 %v2680_v27, %v3012_v53 }
0x14dd   :  { %v2151_v30 = vadd.f32 -1.0, %v1031_v28  ;;  %v1185_v28 = vadd.f32 %v3002_v41, %v3058_v5 }
0x1543   :  { %v1299_v19 = vpop.permute.xlu0 %1298 }
0x1544   :  { %v1301_v20 = vmul.f32 %v2676_v18, %v1299_v19 }
0x1546   :  { %1303 = vrot.lane.b32.xlu1 %v1301_v20, %s2758_s3 }
0x15b8   :  { %v1304_v25 = vpop.permute.xlu1 %1303 }
0x15b9   :  { %v1306_v26 = vadd.f32 %v1304_v25, %v1296_v24 }
0x15bb   :  { %2681 = vtanh.f32 %v1306_v26 }
0x15c5   :  { %v2682_v29 = vpop.eup %2681 }
0x15c6   :  { %1309 = vrot.lane.b32.xlu0 %v2682_v29, %s2757_s15 }
0x15ca   :  { %1035 = vrot.lane.b32.xlu0 %v2151_v30, %s2757_s15 }
0x1638   :  { %v1310_v31 = vpop.permute.xlu0 %1309 }
0x1639   :  { %v1312_v32 = vmul.f32 %v2676_v18, %v1310_v31 }
0x163b   :  { %1315 = vrot.lane.b32.xlu1 %v1312_v32, %s2758_s3 }
0x163c   :  { %v1036_v33 = vpop.permute.xlu0 %1035 }
0x163d   :  { %v1038_v34 = vmul.f32 %v2680_v27, %v1036_v33 }
0x163f   :  { %1040 = vrot.lane.b32.xlu0 %v1038_v34, %s2758_s3 }
0x16ad   :  { %v1316_v35 = vpop.permute.xlu1 %1315 }
0x16ae   :  { %2434 = vmatmul.mubr.msk.f32.vlgmr.msra.gmra.mrb[12].mxu1 %vm209_vm3, %v1316_v35 }
0x16af   :  { %2589 = vmatpush3.bf16.msra.mxu1 %v3022_v57  ;;  %2455 = vmatprep.mubr.msk.f32.mxu1 %vm2755_vm0, %v2756_v1 }
0x16b0   :  { %2590 = vmatprep.subr.bf16.mxu1 %v2754_v0 }
0x16b1   :  { %v1041_v37 = vpop.permute.xlu0 %1040 }
0x16b2   :  { %v1043_v38 = vadd.f32 %v1041_v37, %v1033_v36 }
0x16b3   :  { %2592 = vmatpush3.bf16.msra.mxu1 %v3032_v63 }
0x16b4   :  { %2683 = vtanh.f32 %v1043_v38  ;;  %2599 = vmatprep.subr.bf16.mxu1 %v2754_v0 }
0x16be   :  { %v2684_v40 = vpop.eup %2683 }
0x16bf   :  { %1046 = vrot.lane.b32.xlu0 %v2684_v40, %s2757_s15 }
0x1731   :  { %v1047_v43 = vpop.permute.xlu0 %1046 }
0x1732   :  { %v1049_v44 = vmul.f32 %v2680_v27, %v1047_v43 }
0x1734   :  { %1051 = vrot.lane.b32.xlu0 %v1049_v44, %s2758_s3 }
0x1781   :  { %v1385_v47 = vpop.f32.mrb[12].mxu1 }
0x1782   :  { %v1389_v48 = vadd.f32 %v1385_v47, %v1175_v62  ;;  %v2435_v49 = vpop.f32.mrb[13].mxu1 }
0x1784   :  { %v2164_v50 = vmul.f32 -1.442695, %v1389_v48 }
0x1786   :  { %2685 = vpow2.f32 %v2164_v50  ;;  %v1190_v50 = vadd.f32 %v3058_v5, %v3008_v46 }
0x1790   :  { %v2686_v51 = vpop.eup %2685 }
0x1791   :  { %v1393_v52 = vadd.f32 1.0, %v2686_v51 }
0x1793   :  { %2687 = vrcp.f32 %v1393_v52 }
0x179d   :  { %v2688_v53 = vpop.eup %2687 }
0x179e   :  { %v1396_v54 = vmul.f32 2.0, %v2688_v53  ;;  %v1398_v4 = vmul.f32 %v2688_v53, %v1306_v26 }
0x17a0   :  { %v2165_v55 = vadd.f32 -1.0, %v1396_v54 }
0x17a2   :  { %1400 = vrot.lane.b32.xlu1 %v2165_v55, %s2757_s15 }
0x17a6   :  { %v1052_v56 = vpop.permute.xlu0 %1051 }
0x17a7   :  { %1055 = vst.msk [vmem:[#allocation3 + $0x38] sm:$0xff] %vm209_vm3, %v1052_v56 }
0x17ae   :  { %v1072_v58 = vld [vmem:[#allocation3 + $0x38] sm:$0xff] }
0x17af   :  { %2412 = vmatmul.mubr.msk.f32.gmra.mrb[20].mxu0 %vm209_vm3, %v1072_v58 }
0x17b0   :  { %2444 = vmatprep.mubr.msk.f32.mxu0 %vm2755_vm0, %v2756_v1 }
0x1814   :  { %v1401_v39 = vpop.permute.xlu1 %1400 }
0x1815   :  { %v1403_v60 = vmul.f32 %v2688_v53, %v1401_v39 }
0x1817   :  { %1405 = vrot.lane.b32.xlu1 %v1403_v60, %s2758_s3 }
0x1882   :  { %v3085_v2 = vpop.f32.mrb[20].mxu0 }
0x1883   :  { %v3087_v3 = vpop.f32.mrb[21].mxu0 }
0x1889   :  { %v1406_v6 = vpop.permute.xlu1 %1405 }
0x188a   :  { %v1408_v7 = vadd.f32 %v1406_v6, %v1398_v4 }
0x188c   :  { %2689 = vtanh.f32 %v1408_v7 }
0x1896   :  { %v2690_v8 = vpop.eup %2689 }
0x1897   :  { %1411 = vrot.lane.b32.xlu1 %v2690_v8, %s2757_s15 }
0x1909   :  { %v1412_v9 = vpop.permute.xlu1 %1411 }
0x190a   :  { %v1414_v11 = vmul.f32 %v2688_v53, %v1412_v9 }
0x190c   :  { %1417 = vrot.lane.b32.xlu1 %v1414_v11, %s2758_s3 }
0x197e   :  { %v1418_v13 = vpop.permute.xlu1 %1417 }
0x197f   :  { %2445 = vmatmul.mubr.msk.f32.vlgmr.msra.gmra.mrb[22].mxu0 %vm209_vm3, %v1418_v13 }
0x1980   :  { %2595 = vmatpush3.bf16.msra.mxu0 %v3022_v57  ;;  %2466 = vmatprep.mubr.msk.f32.mxu0 %vm2755_vm0, %v2756_v1 }
0x1981   :  { %2596 = vmatprep.subr.bf16.mxu0 %v2754_v0 }
0x1984   :  { %2598 = vmatpush3.bf16.msra.mxu0 %v3032_v63 }
0x1985   :  { %2605 = vmatprep.subr.bf16.mxu0 %v2754_v0 }
0x1a52   :  { %v1487_v15 = vpop.f32.mrb[22].mxu0 }
0x1a53   :  { %v1491_v10 = vadd.f32 %v1487_v15, %v1180_v14  ;;  %v2446_v16 = vpop.f32.mrb[23].mxu0  ;;  %v1195_v15 = vadd.f32 %v3006_v45, %v3058_v5 }
0x1a55   :  { %v2167_v17 = vmul.f32 -1.442695, %v1491_v10 }
0x1a57   :  { %2691 = vpow2.f32 %v2167_v17 }
0x1a61   :  { %v2692_v59 = vpop.eup %2691 }
0x1a62   :  { %v1495_v18 = vadd.f32 1.0, %v2692_v59 }
0x1a64   :  { %2693 = vrcp.f32 %v1495_v18 }
0x1a6e   :  { %v2694_v12 = vpop.eup %2693 }
0x1a6f   :  { %v1498_v61 = vmul.f32 2.0, %v2694_v12  ;;  %v1500_v22 = vmul.f32 %v2694_v12, %v1408_v7 }
0x1a71   :  { %v2168_v19 = vadd.f32 -1.0, %v1498_v61 }
0x1a73   :  { %1502 = vrot.lane.b32.xlu0 %v2168_v19, %s2757_s15 }
0x1ae5   :  { %v1503_v20 = vpop.permute.xlu0 %1502 }
0x1ae6   :  { %v1505_v21 = vmul.f32 %v2694_v12, %v1503_v20 }
0x1ae8   :  { %1507 = vrot.lane.b32.xlu1 %v1505_v21, %s2758_s3 }
0x1b5a   :  { %v1508_v23 = vpop.permute.xlu1 %1507 }
0x1b5b   :  { %v1510_v42 = vadd.f32 %v1508_v23, %v1500_v22 }
0x1b5d   :  { %2695 = vtanh.f32 %v1510_v42 }
0x1b67   :  { %v2696_v24 = vpop.eup %2695 }
0x1b68   :  { %1513 = vrot.lane.b32.xlu0 %v2696_v24, %s2757_s15 }
0x1bda   :  { %v1514_v25 = vpop.permute.xlu0 %1513 }
0x1bdb   :  { %v1516_v26 = vmul.f32 %v2694_v12, %v1514_v25 }
0x1bdd   :  { %1519 = vrot.lane.b32.xlu1 %v1516_v26, %s2758_s3  ;;  %v1200_v26 = vadd.f32 %v3058_v5, %v3087_v3 }
0x1c4f   :  { %v1520_v27 = vpop.permute.xlu1 %1519 }
0x1c50   :  { %2456 = vmatmul.mubr.msk.f32.vlgmr.msra.gmra.mrb[14].mxu1 %vm209_vm3, %v1520_v27 }
0x1c51   :  { %2601 = vmatpush3.bf16.msra.mxu1 %v3022_v57  ;;  %2477 = vmatprep.mubr.msk.f32.mxu1 %vm2755_vm0, %v2756_v1 }
0x1c52   :  { %2602 = vmatprep.subr.bf16.mxu1 %v2754_v0 }
0x1c55   :  { %2604 = vmatpush3.bf16.msra.mxu1 %v3032_v63 }
0x1c56   :  { %2611 = vmatprep.subr.bf16.mxu1 %v2754_v0 }
0x1d23   :  { %v1589_v29 = vpop.f32.mrb[14].mxu1 }
0x1d24   :  { %v1593_v30 = vadd.f32 %v1589_v29, %v1185_v28  ;;  %v2457_v31 = vpop.f32.mrb[15].mxu1 }
0x1d26   :  { %v2170_v32 = vmul.f32 -1.442695, %v1593_v30 }
0x1d28   :  { %2697 = vpow2.f32 %v2170_v32 }
0x1d32   :  { %v2698_v33 = vpop.eup %2697 }
0x1d33   :  { %v1597_v34 = vadd.f32 1.0, %v2698_v33 }
0x1d35   :  { %2699 = vrcp.f32 %v1597_v34 }
0x1d3f   :  { %v2700_v35 = vpop.eup %2699 }
0x1d40   :  { %v1600_v36 = vmul.f32 2.0, %v2700_v35  ;;  %v1602_v43 = vmul.f32 %v2700_v35, %v1510_v42 }
0x1d42   :  { %v2171_v37 = vadd.f32 -1.0, %v1600_v36 }
0x1d44   :  { %1604 = vrot.lane.b32.xlu0 %v2171_v37, %s2757_s15 }
0x1db6   :  { %v1605_v38 = vpop.permute.xlu0 %1604 }
0x1db7   :  { %v1607_v40 = vmul.f32 %v2700_v35, %v1605_v38 }
0x1db9   :  { %1609 = vrot.lane.b32.xlu1 %v1607_v40, %s2758_s3 }
0x1e2b   :  { %v1610_v44 = vpop.permute.xlu1 %1609 }
0x1e2c   :  { %v1612_v41 = vadd.f32 %v1610_v44, %v1602_v43 }
0x1e2e   :  { %2701 = vtanh.f32 %v1612_v41 }
0x1e38   :  { %v2702_v62 = vpop.eup %2701 }
0x1e39   :  { %1615 = vrot.lane.b32.xlu0 %v2702_v62, %s2757_s15  ;;  %v1205_v62 = vadd.f32 %v3085_v2, %v3058_v5  ;;  %v2027_v2 = vld [vmem:[#allocation4] sm:$0xff] }
0x1eab   :  { %v1616_v47 = vpop.permute.xlu0 %1615 }
0x1eac   :  { %v1618_v48 = vmul.f32 %v2700_v35, %v1616_v47 }
0x1eae   :  { %1621 = vrot.lane.b32.xlu1 %v1618_v48, %s2758_s3 }
0x1f20   :  { %v1622_v49 = vpop.permute.xlu1 %1621 }
0x1f21   :  { %2467 = vmatmul.mubr.msk.f32.vlgmr.msra.gmra.mrb[24].mxu0 %vm209_vm3, %v1622_v49 }
0x1f22   :  { %2607 = vmatpush3.bf16.msra.mxu0 %v3022_v57  ;;  %2488 = vmatprep.mubr.msk.f32.mxu0 %vm2755_vm0, %v2756_v1 }
0x1f23   :  { %2608 = vmatprep.subr.bf16.mxu0 %v2754_v0 }
0x1f26   :  { %2610 = vmatpush3.bf16.msra.mxu0 %v3032_v63 }
0x1f27   :  { %2617 = vmatprep.subr.bf16.mxu0 %v2754_v0 }
0x1ff4   :  { %v1691_v51 = vpop.f32.mrb[24].mxu0 }
0x1ff5   :  { %v1695_v52 = vadd.f32 %v1691_v51, %v1190_v50  ;;  %v2468_v53 = vpop.f32.mrb[25].mxu0 }
0x1ff7   :  { %v2173_v54 = vmul.f32 -1.442695, %v1695_v52 }
0x1ff9   :  { %2703 = vpow2.f32 %v2173_v54 }
0x2003   :  { %v2704_v55 = vpop.eup %2703 }
0x2004   :  { %v1699_v56 = vadd.f32 1.0, %v2704_v55 }
0x2006   :  { %2705 = vrcp.f32 %v1699_v56 }
0x2010   :  { %v2706_v58 = vpop.eup %2705 }
0x2011   :  { %v1702_v39 = vmul.f32 2.0, %v2706_v58  ;;  %v1704_v7 = vmul.f32 %v2706_v58, %v1612_v41 }
0x2013   :  { %v2174_v60 = vadd.f32 -1.0, %v1702_v39 }
0x2015   :  { %1706 = vrot.lane.b32.xlu0 %v2174_v60, %s2757_s15 }
0x2087   :  { %v1707_v4 = vpop.permute.xlu0 %1706 }
0x2088   :  { %v1709_v6 = vmul.f32 %v2706_v58, %v1707_v4  ;;  %v2028_v4 = vld [vmem:[#allocation4 + $0x8] sm:$0xff] }
0x208a   :  { %1711 = vrot.lane.b32.xlu1 %v1709_v6, %s2758_s3  ;;  %v2029_v6 = vld [vmem:[#allocation4 + $0x10] sm:$0xff] }
0x20fc   :  { %v1712_v8 = vpop.permute.xlu1 %1711 }
0x20fd   :  { %v1714_v46 = vadd.f32 %v1712_v8, %v1704_v7  ;;  %v2618_v7 = vpack.c.bf16 %v2028_v4, %v2027_v2  ;;  %v2030_v8 = vld [vmem:[#allocation4 + $0x18] sm:$0xff] }
0x20ff   :  { %2707 = vtanh.f32 %v1714_v46 }
0x2109   :  { %v2708_v9 = vpop.eup %2707 }
0x210a   :  { %1717 = vrot.lane.b32.xlu0 %v2708_v9, %s2757_s15 }
0x217c   :  { %v1718_v11 = vpop.permute.xlu0 %1717 }
0x217d   :  { %v1720_v13 = vmul.f32 %v2706_v58, %v1718_v11 }
0x217f   :  { %1723 = vrot.lane.b32.xlu1 %v1720_v13, %s2758_s3 }
0x21f1   :  { %v1724_v14 = vpop.permute.xlu1 %1723 }
0x21f2   :  { %2478 = vmatmul.mubr.msk.f32.vlgmr.msra.gmra.mrb[16].mxu1 %vm209_vm3, %v1724_v14 }
0x21f3   :  { %2613 = vmatpush3.bf16.msra.mxu1 %v3022_v57  ;;  %2499 = vmatprep.mubr.msk.f32.mxu1 %vm2755_vm0, %v2756_v1 }
0x21f4   :  { %2614 = vmatprep.subr.bf16.mxu1 %v2754_v0 }
0x21f7   :  { %2616 = vmatpush3.bf16.msra.mxu1 %v3032_v63 }
0x22c5   :  { %v1793_v10 = vpop.f32.mrb[16].mxu1 }
0x22c6   :  { %v1797_v16 = vadd.f32 %v1793_v10, %v1195_v15  ;;  %v2479_v17 = vpop.f32.mrb[17].mxu1  ;;  %v2184_v15 = vld [vmem:[%s3174_s8] ss:$0 sm:$0xff] }
0x22c8   :  { %v2176_v59 = vmul.f32 -1.442695, %v1797_v16 }
0x22ca   :  { %2709 = vpow2.f32 %v2176_v59 }
0x22d4   :  { %v2710_v18 = vpop.eup %2709 }
0x22d5   :  { %v1801_v12 = vadd.f32 1.0, %v2710_v18 }
0x22d7   :  { %2711 = vrcp.f32 %v1801_v12 }
0x22e1   :  { %v2712_v61 = vpop.eup %2711 }
0x22e2   :  { %v1804_v57 = vmul.f32 2.0, %v2712_v61  ;;  %v1806_v63 = vmul.f32 %v2712_v61, %v1714_v46  ;;  %v2621_v46 = vpack.c.bf16 %v2030_v8, %v2029_v6 }
0x22e4   :  { %v2177_v19 = vadd.f32 -1.0, %v1804_v57 }
0x22e6   :  { %1808 = vrot.lane.b32.xlu0 %v2177_v19, %s2757_s15 }
0x2358   :  { %v1809_v20 = vpop.permute.xlu0 %1808 }
0x2359   :  { %v1811_v21 = vmul.f32 %v2712_v61, %v1809_v20 }
0x235b   :  { %1813 = vrot.lane.b32.xlu1 %v1811_v21, %s2758_s3 }
0x23cd   :  { %v1814_v22 = vpop.permute.xlu1 %1813 }
0x23ce   :  { %v1816_v45 = vadd.f32 %v1814_v22, %v1806_v63 }
0x23d0   :  { %2713 = vtanh.f32 %v1816_v45 }
0x23da   :  { %v2714_v23 = vpop.eup %2713 }
0x23db   :  { %1819 = vrot.lane.b32.xlu0 %v2714_v23, %s2757_s15 }
0x244d   :  { %v1820_v42 = vpop.permute.xlu0 %1819 }
0x244e   :  { %v1822_v24 = vmul.f32 %v2712_v61, %v1820_v42 }
0x2450   :  { %1825 = vrot.lane.b32.xlu1 %v1822_v24, %s2758_s3 }
0x24c2   :  { %v1826_v25 = vpop.permute.xlu1 %1825 }
0x24c3   :  { %2489 = vmatmul.mubr.msk.f32.vlgmr.msra.gmra.mrb[26].mxu0 %vm209_vm3, %v1826_v25 }
0x24c4   :  { %2510 = vmatprep.mubr.msk.f32.mxu0 %vm2755_vm0, %v2756_v1  ;;  %2619 = vmatpush3.bf16.msra.mxu0 %v2618_v7 }
0x24c5   :  { %2620 = vmatprep.subr.bf16.mxu0 %v2754_v0 }
0x24c8   :  { %2622 = vmatpush3.bf16.msra.mxu0 %v2621_v46 }
0x2596   :  { %v1895_v27 = vpop.f32.mrb[26].mxu0 }
0x2597   :  { %v1899_v28 = vadd.f32 %v1895_v27, %v1200_v26  ;;  %v2490_v29 = vpop.f32.mrb[27].mxu0 }
0x2599   :  { %v2179_v30 = vmul.f32 -1.442695, %v1899_v28 }
0x259b   :  { %2715 = vpow2.f32 %v2179_v30 }
0x25a5   :  { %v2716_v31 = vpop.eup %2715 }
0x25a6   :  { %v1903_v32 = vadd.f32 1.0, %v2716_v31 }
0x25a8   :  { %2717 = vrcp.f32 %v1903_v32 }
0x25b2   :  { %v2718_v33 = vpop.eup %2717 }
0x25b3   :  { %v1906_v34 = vmul.f32 2.0, %v2718_v33  ;;  %v1908_v1 = vmul.f32 %v2718_v33, %v1816_v45 }
0x25b5   :  { %v2180_v35 = vadd.f32 -1.0, %v1906_v34 }
0x25b7   :  { %1910 = vrot.lane.b32.xlu0 %v2180_v35, %s2757_s15 }
0x2629   :  { %v1911_v36 = vpop.permute.xlu0 %1910 }
0x262a   :  { %v1913_v37 = vmul.f32 %v2718_v33, %v1911_v36 }
0x262c   :  { %1915 = vrot.lane.b32.xlu1 %v1913_v37, %s2758_s3 }
0x269e   :  { %v1916_v38 = vpop.permute.xlu1 %1915 }
0x269f   :  { %v1918_v3 = vadd.f32 %v1916_v38, %v1908_v1 }
0x26a1   :  { %2719 = vtanh.f32 %v1918_v3 }
0x26ab   :  { %v2720_v40 = vpop.eup %2719 }
0x26ac   :  { %1921 = vrot.lane.b32.xlu0 %v2720_v40, %s2757_s15 }
0x271e   :  { %v1922_v43 = vpop.permute.xlu0 %1921 }
0x271f   :  { %v1924_v44 = vmul.f32 %v2718_v33, %v1922_v43 }
0x2721   :  { %1927 = vrot.lane.b32.xlu1 %v1924_v44, %s2758_s3 }
0x2793   :  { %v1928_v41 = vpop.permute.xlu1 %1927 }
0x2794   :  { %2500 = vmatmul.mubr.msk.f32.vlgmr.msra.gmra.mrb[18].mxu1 %vm209_vm3, %v1928_v41 }
0x2867   :  { %v1997_v47 = vpop.f32.mrb[18].mxu1 }
0x2868   :  { %v2001_v48 = vadd.f32 %v1997_v47, %v1205_v62  ;;  %v2501_v49 = vpop.f32.mrb[19].mxu1 }
0x286a   :  { %v2182_v50 = vmul.f32 -1.442695, %v2001_v48 }
0x286c   :  { %2721 = vpow2.f32 %v2182_v50 }
0x2876   :  { %v2722_v51 = vpop.eup %2721 }
0x2877   :  { %v2005_v52 = vadd.f32 1.0, %v2722_v51 }
0x2879   :  { %2723 = vrcp.f32 %v2005_v52 }
0x2883   :  { %v2724_v53 = vpop.eup %2723 }
0x2884   :  { %v2008_v54 = vmul.f32 2.0, %v2724_v53  ;;  %v2010_v39 = vmul.f32 %v2724_v53, %v1918_v3 }
0x2886   :  { %v2183_v55 = vadd.f32 -1.0, %v2008_v54 }
0x2888   :  { %2012 = vrot.lane.b32.xlu0 %v2183_v55, %s2757_s15 }
0x28fa   :  { %v2013_v56 = vpop.permute.xlu0 %2012 }
0x28fb   :  { %v2015_v58 = vmul.f32 %v2724_v53, %v2013_v56 }
0x28fd   :  { %2017 = vrot.lane.b32.xlu1 %v2015_v58, %s2758_s3 }
0x296f   :  { %v2018_v60 = vpop.permute.xlu1 %2017 }
0x2970   :  { %v2020_v5 = vadd.f32 %v2018_v60, %v2010_v39 }
0x2972   :  { %2725 = vtanh.f32 %v2020_v5 }
0x297c   :  { %v2726_v9 = vpop.eup %2725 }
0x297d   :  { %2023 = vrot.lane.b32.xlu0 %v2726_v9, %s2757_s15 }
0x29ef   :  { %v2024_v11 = vpop.permute.xlu0 %2023 }
0x29f0   :  { %v2026_v13 = vmul.f32 %v2724_v53, %v2024_v11 }
0x29f2   :  { %2039 = vrot.lane.b32.xlu1 %v2026_v13, %s2758_s3 }
0x2a64   :  { %v2040_v14 = vpop.permute.xlu1 %2039 }
0x2a65   :  { %2511 = vmatmul.mubr.msk.f32.vlgmr.msra.gmra.mrb[28].mxu0 %vm209_vm3, %v2040_v14 }
0x2b38   :  { %v2109_v10 = vpop.f32.mrb[28].mxu0 }
0x2b39   :  { %v2110_v16 = vadd.f32 %v2184_v15, %v2109_v10  ;;  %v2512_v17 = vpop.f32.mrb[29].mxu0 }
0x2b3b   :  { %2113 = vst [vmem:[%s3175_s9] sm:$0xff] %v2110_v16 }
0x2b3c   :  { %2118 = vsyncpa [#allocation5], 1 }

</bundles_post_ra>
